<compile_context>
chip_gen: v5e
topology: v5e:2x2
jax: 0.10.0
libtpu: 0.0.40
codegen_flags: <defaults>
</compile_context>

<pallas_src>
import functools

import jax
import jax.numpy as jnp
from jax import lax
from jax.experimental import pallas as pl
from jax.experimental.pallas import tpu as pltpu

INPUT_DIM = 4
HIDDEN = 256
EPS = 0.1


def _round_up(n, m):
    return ((n + m - 1) // m) * m


def _lyapunov_kernel(x_ref, w0_ref, b0_ref, w1_ref, b1_ref, w2_ref, b2_ref,
                     out_ref, *, act_dtype):
    """One batch tile of the Lyapunov network.

    x_ref  : (tb, D)  f32        input tile in natural (batch, feature) layout
    w0_ref : (H, D)   f32        layer 0 weight (tiny K, kept f32)
    w1_ref : (H, H)   f32/bf16   MXU operand dtype = stored-intermediate dtype
    w2_ref : (H, H)   f32/bf16
    bK_ref : (H, 1)   f32        biases broadcast along lanes
    out_ref: (1, tb)  f32        lane-dense V(x) row
    act_dtype                     dtype of the bias-add result fed to tanh
    """
    cdt = w1_ref.dtype  # stored / MXU-operand dtype of the big layers
    x = x_ref[...]

    # Layer 0: contract D (tiny K) with both operands contracting their last
    # dim (A @ B^T form) -> (H, tb); keeps batch on the lane axis, no wrapper
    # transpose needed.  f32 accumulation.
    pre = lax.dot_general(
        w0_ref[...], x, (((1,), (1,)), ((), ())),
        preferred_element_type=jnp.float32) + b0_ref[...]
    h = jnp.tanh(pre.astype(act_dtype)).astype(cdt)

    # Layers 1 & 2: 256x256 MXU matmuls, f32 accumulation; bias add in f32,
    # tanh in act_dtype (bf16 halves EUP pushes on v6e/v7x), and the stored
    # (H, tb) intermediate is bf16 at the producer (halves vld/vst traffic).
    pre = jnp.dot(w1_ref[...], h,
                  preferred_element_type=jnp.float32) + b1_ref[...]
    h = jnp.tanh(pre.astype(act_dtype)).astype(cdt)

    pre = jnp.dot(w2_ref[...], h,
                  preferred_element_type=jnp.float32) + b2_ref[...]
    h = jnp.tanh(pre.astype(act_dtype)).astype(cdt)

    # V(x) = sum_j h_j^2 : square on the VPU, reduce over the feature axis on
    # the MXU via a ones row (f32 accumulation).  Result (1, tb) is
    # lane-dense, stored with unmasked full-width stores.
    ones_row = jnp.ones((1, h.shape[0]), dtype=cdt)
    out_ref[...] = jnp.dot(ones_row, h * h,
                           preferred_element_type=jnp.float32
                           ).astype(out_ref.dtype)


@functools.partial(jax.jit,
                   static_argnames=("block_b", "use_bf16", "bf16_act"))
def lyapunov_forward(x, params, *, block_b=2048, use_bf16=True,
                     bf16_act=True):
    """LyapunovNetwork forward: x (B, input_dim) -> (B, 1) float32.

    params = (w0, b0, w1, b1, w2, b2) in PyTorch nn.Linear layout:
      wK: (out_features, in_features), bK: (out_features,).
    use_bf16 : bf16 MXU operands + bf16 stored intermediates (f32 accum).
    bf16_act : do the tanh in bf16 (fast on v6e/v7x); only active if use_bf16.
    """
    w0, b0, w1, b1, w2, b2 = params
    B, D = x.shape
    H = w1.shape[0]

    cdt = jnp.bfloat16 if use_bf16 else jnp.float32
    adt = jnp.bfloat16 if (use_bf16 and bf16_act) else jnp.float32

    w0 = w0.astype(jnp.float32)
    w1 = w1.astype(cdt)
    w2 = w2.astype(cdt)
    b0 = b0.reshape(H, 1).astype(jnp.float32)
    b1 = b1.reshape(H, 1).astype(jnp.float32)
    b2 = b2.reshape(H, 1).astype(jnp.float32)

    # ---- batch tiling -----------------------------------------------------
    # Large tiles amortize the ~0.35us/grid-step overhead; from B > 256 we use
    # an EVEN number of lane-aligned tiles so the "parallel" axis shards
    # evenly across v7x's two TensorCores (no effect on v5e/v6e).
    if B <= 256:
        tb = _round_up(B, 8)                      # single small tile
    else:
        nt = max(2, pl.cdiv(B, block_b))
        if nt % 2:
            nt += 1                               # even tile count (megacore)
        tb = _round_up(pl.cdiv(B, nt), 128)
    B_pad = _round_up(B, tb)
    num_tiles = B_pad // tb

    x = x.astype(jnp.float32)
    if B_pad != B:
        # Row-only zero pad in natural layout (no transpose round-trip).
        x = jnp.pad(x, ((0, B_pad - B), (0, 0)))

    flops = 2 * B_pad * (D * H + 2 * H * H) + 3 * B_pad * H  # +square/reduce
    transcendentals = 3 * H * B_pad
    bytes_accessed = (
        x.size * x.dtype.itemsize + B_pad * 4
        + sum(int(a.size) * a.dtype.itemsize
              for a in (w0, b0, w1, b1, w2, b2)))

    kernel = functools.partial(_lyapunov_kernel, act_dtype=adt)

    out = pl.pallas_call(
        kernel,
        out_shape=jax.ShapeDtypeStruct((1, B_pad), jnp.float32),
        grid_spec=pltpu.PrefetchScalarGridSpec(
            num_scalar_prefetch=0,
            grid=(num_tiles,),
            in_specs=[
                pl.BlockSpec((tb, D), lambda i: (i, 0)),   # x tile (natural)
                pl.BlockSpec((H, D), lambda i: (0, 0)),    # W0 (VMEM-resident)
                pl.BlockSpec((H, 1), lambda i: (0, 0)),    # b0
                pl.BlockSpec((H, H), lambda i: (0, 0)),    # W1
                pl.BlockSpec((H, 1), lambda i: (0, 0)),    # b1
                pl.BlockSpec((H, H), lambda i: (0, 0)),    # W2
                pl.BlockSpec((H, 1), lambda i: (0, 0)),    # b2
            ],
            out_specs=pl.BlockSpec((1, tb), lambda i: (0, i)),  # lane-dense
        ),
        compiler_params=pltpu.CompilerParams(
            dimension_semantics=("parallel",)),
        cost_estimate=pl.CostEstimate(
            flops=flops,
            transcendentals=transcendentals,
            bytes_accessed=bytes_accessed),
    )(x, w0, b0, w1, b1, w2, b2)

    return out[0, :B].reshape(B, 1)


def init_params(key, input_dim=INPUT_DIM, hidden=HIDDEN, eps=EPS):
    """Parameter init mirroring LyapunovNetwork.__init__ (PyTorch layout).

    Weights: xavier_normal_, then += eps * eye(out, in).
    Biases : nn.Linear default U(-1/sqrt(fan_in), 1/sqrt(fan_in)).
    """
    keys = jax.random.split(key, 6)

    def xavier_normal(k, out_f, in_f):
        std = (2.0 / (in_f + out_f)) ** 0.5
        return std * jax.random.normal(k, (out_f, in_f), dtype=jnp.float32)

    def bias(k, out_f, in_f):
        bound = 1.0 / (in_f ** 0.5)
        return jax.random.uniform(k, (out_f,), minval=-bound, maxval=bound,
                                  dtype=jnp.float32)

    w0 = xavier_normal(keys[0], hidden, input_dim) + eps * jnp.eye(
        hidden, input_dim, dtype=jnp.float32)
    w1 = xavier_normal(keys[1], hidden, hidden) + eps * jnp.eye(
        hidden, dtype=jnp.float32)
    w2 = xavier_normal(keys[2], hidden, hidden) + eps * jnp.eye(
        hidden, dtype=jnp.float32)
    b0 = bias(keys[3], hidden, input_dim)
    b1 = bias(keys[4], hidden, hidden)
    b2 = bias(keys[5], hidden, hidden)
    return (w0, b0, w1, b1, w2, b2)


def reference_forward(x, params):
    """Pure-JAX reference matching the PyTorch forward()."""
    w0, b0, w1, b1, w2, b2 = params
    h = jnp.tanh(x @ w0.T + b0)
    h = jnp.tanh(h @ w1.T + b1)
    h = jnp.tanh(h @ w2.T + b2)
    return jnp.sum(h * h, axis=1, keepdims=True)


if __name__ == "__main__":
    key = jax.random.PRNGKey(0)
    k_param, k_x, k_x2 = jax.random.split(key, 3)

    params = init_params(k_param)

    batch = 8
    x = jax.random.normal(k_x, (batch, INPUT_DIM), dtype=jnp.float32)
    ref = reference_forward(x, params)

    # Full-f32 path: check tightly against the pure-JAX reference.
    out_f32 = jax.block_until_ready(
        lyapunov_forward(x, params, use_bf16=False))
    assert out_f32.shape == (batch, 1), out_f32.shape
    assert jnp.allclose(out_f32, ref, atol=5e-3, rtol=5e-3), (out_f32, ref)

    # bf16 MXU operands + bf16 tanh (fast path on v6e/v7x), f32 accumulation.
    out_bf16 = jax.block_until_ready(
        lyapunov_forward(x, params, use_bf16=True, bf16_act=True))
    assert out_bf16.shape == (batch, 1), out_bf16.shape
    assert jnp.allclose(out_bf16, ref, atol=7e-2, rtol=7e-2), (out_bf16, ref)

    # bf16 stored intermediates but f32 tanh (v5e-style path).
    out_mix = jax.block_until_ready(
        lyapunov_forward(x, params, use_bf16=True, bf16_act=False))
    assert out_mix.shape == (batch, 1), out_mix.shape
    assert jnp.allclose(out_mix, ref, atol=7e-2, rtol=7e-2), (out_mix, ref)

    # Batch not divisible by 8 / the tile: exercises the row-padding path.
    x2 = jax.random.normal(k_x2, (5, INPUT_DIM), dtype=jnp.float32)
    out2 = jax.block_until_ready(
        lyapunov_forward(x2, params, use_bf16=False))
    assert out2.shape == (5, 1), out2.shape
    assert jnp.allclose(out2, reference_forward(x2, params),
                        atol=5e-3, rtol=5e-3), out2

    print("KERNEL_OK")
</pallas_src>

<mosaic_0001>
module attributes {stable_mosaic.version = 11 : i64} {
  func.func @_lyapunov_kernel(%arg0: i32, %arg1: memref<8x4xf32, #tpu.memory_space<vmem>>, %arg2: memref<256x4xf32, #tpu.memory_space<vmem>>, %arg3: memref<256x1xf32, #tpu.memory_space<vmem>>, %arg4: memref<256x256xf32, #tpu.memory_space<vmem>>, %arg5: memref<256x1xf32, #tpu.memory_space<vmem>>, %arg6: memref<256x256xf32, #tpu.memory_space<vmem>>, %arg7: memref<256x1xf32, #tpu.memory_space<vmem>>, %arg8: memref<1x8xf32, #tpu.memory_space<vmem>>) attributes {dimension_semantics = [#tpu.dimension_semantics<parallel>], iteration_bounds = array<i64: 1>, scalar_prefetch = 0 : i64, scratch_operands = 0 : i64, tpu.core_type = #tpu.core_type<tc>, window_params = [{transform_indices = @transform_0, window_bounds = array<i64: 8, 4>}, {pipeline_mode = #tpu.pipeline_mode<synchronous>, transform_indices = @transform_1, window_bounds = array<i64: 256, 4>}, {pipeline_mode = #tpu.pipeline_mode<synchronous>, transform_indices = @transform_2, window_bounds = array<i64: 256, 1>}, {pipeline_mode = #tpu.pipeline_mode<synchronous>, transform_indices = @transform_3, window_bounds = array<i64: 256, 256>}, {pipeline_mode = #tpu.pipeline_mode<synchronous>, transform_indices = @transform_4, window_bounds = array<i64: 256, 1>}, {pipeline_mode = #tpu.pipeline_mode<synchronous>, transform_indices = @transform_5, window_bounds = array<i64: 256, 256>}, {pipeline_mode = #tpu.pipeline_mode<synchronous>, transform_indices = @transform_6, window_bounds = array<i64: 256, 1>}, {transform_indices = @transform_7, window_bounds = array<i64: 1, 8>}]} {
    %c0 = arith.constant 0 : index
    %c0_0 = arith.constant 0 : index
    %0 = vector.load %arg1[%c0, %c0_0] : memref<8x4xf32, #tpu.memory_space<vmem>>, vector<8x4xf32>
    %c0_1 = arith.constant 0 : index
    %c0_2 = arith.constant 0 : index
    %1 = vector.load %arg2[%c0_1, %c0_2] : memref<256x4xf32, #tpu.memory_space<vmem>>, vector<256x4xf32>
    %cst = arith.constant dense<0.000000e+00> : vector<256x8xf32>
    %2 = tpu.matmul %1, %0, %cst {dimension_numbers = #tpu.dot_dimension_numbers<[1], [1], [0], [0], [0, 0, 1, 0], [], []>} : vector<256x4xf32>, vector<8x4xf32>, vector<256x8xf32> -> vector<256x8xf32>
    %c0_3 = arith.constant 0 : index
    %c0_4 = arith.constant 0 : index
    %3 = vector.load %arg3[%c0_3, %c0_4] : memref<256x1xf32, #tpu.memory_space<vmem>>, vector<256x1xf32>
    %4 = vector.broadcast %3 : vector<256x1xf32> to vector<256x8xf32>
    %5 = arith.addf %2, %4 : vector<256x8xf32>
    %6 = math.tanh %5 : vector<256x8xf32>
    %c0_5 = arith.constant 0 : index
    %c0_6 = arith.constant 0 : index
    %7 = vector.load %arg4[%c0_5, %c0_6] : memref<256x256xf32, #tpu.memory_space<vmem>>, vector<256x256xf32>
    %cst_7 = arith.constant dense<0.000000e+00> : vector<256x8xf32>
    %8 = tpu.matmul %7, %6, %cst_7 {dimension_numbers = #tpu.dot_dimension_numbers<[1], [0], [0], [1], [0, 0, 1, 1], [], []>} : vector<256x256xf32>, vector<256x8xf32>, vector<256x8xf32> -> vector<256x8xf32>
    %c0_8 = arith.constant 0 : index
    %c0_9 = arith.constant 0 : index
    %9 = vector.load %arg5[%c0_8, %c0_9] : memref<256x1xf32, #tpu.memory_space<vmem>>, vector<256x1xf32>
    %10 = vector.broadcast %9 : vector<256x1xf32> to vector<256x8xf32>
    %11 = arith.addf %8, %10 : vector<256x8xf32>
    %12 = math.tanh %11 : vector<256x8xf32>
    %c0_10 = arith.constant 0 : index
    %c0_11 = arith.constant 0 : index
    %13 = vector.load %arg6[%c0_10, %c0_11] : memref<256x256xf32, #tpu.memory_space<vmem>>, vector<256x256xf32>
    %cst_12 = arith.constant dense<0.000000e+00> : vector<256x8xf32>
    %14 = tpu.matmul %13, %12, %cst_12 {dimension_numbers = #tpu.dot_dimension_numbers<[1], [0], [0], [1], [0, 0, 1, 1], [], []>} : vector<256x256xf32>, vector<256x8xf32>, vector<256x8xf32> -> vector<256x8xf32>
    %c0_13 = arith.constant 0 : index
    %c0_14 = arith.constant 0 : index
    %15 = vector.load %arg7[%c0_13, %c0_14] : memref<256x1xf32, #tpu.memory_space<vmem>>, vector<256x1xf32>
    %16 = vector.broadcast %15 : vector<256x1xf32> to vector<256x8xf32>
    %17 = arith.addf %14, %16 : vector<256x8xf32>
    %18 = math.tanh %17 : vector<256x8xf32>
    %cst_15 = arith.constant 1.000000e+00 : f32
    %19 = vector.broadcast %cst_15 : f32 to vector<1x256xf32>
    %20 = arith.mulf %18, %18 : vector<256x8xf32>
    %cst_16 = arith.constant dense<0.000000e+00> : vector<1x8xf32>
    %21 = tpu.matmul %19, %20, %cst_16 {dimension_numbers = #tpu.dot_dimension_numbers<[1], [0], [0], [1], [0, 0, 1, 1], [], []>} : vector<1x256xf32>, vector<256x8xf32>, vector<1x8xf32> -> vector<1x8xf32>
    %c0_17 = arith.constant 0 : index
    %c0_18 = arith.constant 0 : index
    %22 = vector.load %arg8[%c0_17, %c0_18] : memref<1x8xf32, #tpu.memory_space<vmem>>, vector<1x8xf32>
    tpu.vector_store %arg8[%c0_17, %c0_18], %21 {strides = array<i32>} : memref<1x8xf32, #tpu.memory_space<vmem>>, vector<1x8xf32>,
    return
  }
  func.func @transform_0(%arg0: i32) -> (i32, i32) {
    %c0_i32 = arith.constant 0 : i32
    %c0_i32_0 = arith.constant 0 : i32
    return %arg0, %c0_i32 : i32, i32
  }
  func.func @transform_1(%arg0: i32) -> (i32, i32) {
    %c0_i32 = arith.constant 0 : i32
    %c0_i32_0 = arith.constant 0 : i32
    %c0_i32_1 = arith.constant 0 : i32
    return %c0_i32, %c0_i32_0 : i32, i32
  }
  func.func @transform_2(%arg0: i32) -> (i32, i32) {
    %c0_i32 = arith.constant 0 : i32
    %c0_i32_0 = arith.constant 0 : i32
    %c0_i32_1 = arith.constant 0 : i32
    return %c0_i32, %c0_i32_0 : i32, i32
  }
  func.func @transform_3(%arg0: i32) -> (i32, i32) {
    %c0_i32 = arith.constant 0 : i32
    %c0_i32_0 = arith.constant 0 : i32
    %c0_i32_1 = arith.constant 0 : i32
    return %c0_i32, %c0_i32_0 : i32, i32
  }
  func.func @transform_4(%arg0: i32) -> (i32, i32) {
    %c0_i32 = arith.constant 0 : i32
    %c0_i32_0 = arith.constant 0 : i32
    %c0_i32_1 = arith.constant 0 : i32
    return %c0_i32, %c0_i32_0 : i32, i32
  }
  func.func @transform_5(%arg0: i32) -> (i32, i32) {
    %c0_i32 = arith.constant 0 : i32
    %c0_i32_0 = arith.constant 0 : i32
    %c0_i32_1 = arith.constant 0 : i32
    return %c0_i32, %c0_i32_0 : i32, i32
  }
  func.func @transform_6(%arg0: i32) -> (i32, i32) {
    %c0_i32 = arith.constant 0 : i32
    %c0_i32_0 = arith.constant 0 : i32
    %c0_i32_1 = arith.constant 0 : i32
    return %c0_i32, %c0_i32_0 : i32, i32
  }
  func.func @transform_7(%arg0: i32) -> (i32, i32) {
    %c0_i32 = arith.constant 0 : i32
    %c0_i32_0 = arith.constant 0 : i32
    return %c0_i32, %arg0 : i32, i32
  }
}

</mosaic_0001>

<bundles_post_ra>
// kernel: lyapunov_forward.1
= control target key start
LH: loop header
LB: loop body
LE: loop exit
PB: predicated region body
PF: predicated region fallthrough
CT: control target
= control target key end

     0   :  { %vm252_vm0 = vcmask 31744   ;;  %v1875_v1 = vmov 0   ;;  %s3139_s0 = inlined_call_operand.vmem [shape: f32[8,4], index: 0, kind: input, shape index: {}]   ;;  %s3140_s1 = inlined_call_operand.vmem [shape: f32[256,4], index: 1, kind: input, shape index: {}]   ;;  %s3141_s2 = inlined_call_operand.vmem [shape: f32[256,1], index: 2, kind: input, shape index: {}]   ;;  %s3142_s3 = inlined_call_operand.vmem [shape: f32[256,256], index: 3, kind: input, shape index: {}]   ;;  %s3143_s4 = inlined_call_operand.vmem [shape: f32[256,1], index: 4, kind: input, shape index: {}]   ;;  %s3144_s5 = inlined_call_operand.vmem [shape: f32[256,256], index: 5, kind: input, shape index: {}]   ;;  %s3145_s6 = inlined_call_operand.vmem [shape: f32[256,1], index: 6, kind: input, shape index: {}]   ;;  %s3146_s7 = inlined_call_operand.hbm [shape: f32[1,8], index: 7, kind: output, shape index: {}]  }
   0x1   :  { %v27_v0 = vld [vmem:[%s3139_s0] sm:$0xff]  ;;  %1656 = vset.pattern.permute.xlu2 %v1875_v1  ;;  %1655 = vset.pattern.permute.xlu1 %v1875_v1  ;;  %v91_v2 = vld [vmem:[%s3141_s2 + $0xf8] sm:$0xff]  ;;  %v74_v4 = vld [vmem:[%s3141_s2 + $0x70] sm:$0xff] }
   0x2   :  { %v75_v3 = vld [vmem:[%s3141_s2 + $0x78] sm:$0xff]  ;;  %1654 = vset.pattern.permute.xlu0 %v1875_v1  ;;  %1615 = vmatpush.xpose.msk.msra.mxu0 %vm252_vm0, %v27_v0  ;;  %v28_v5 = vld [vmem:[%s3140_s1] sm:$0xff]  ;;  %v50_v7 = vld [vmem:[%s3140_s1 + $0xb0] sm:$0xff] }
   0x3   :  { %1649 = vmatpush.xpose.msk.msra.mxu2 %vm252_vm0, %v27_v0  ;;  %1650 = vmatpush.xpose.msk.msra.mxu3 %vm252_vm0, %v27_v0  ;;  %v43_v6 = vld [vmem:[%s3140_s1 + $0x78] sm:$0xff]  ;;  %v90_v9 = vld [vmem:[%s3141_s2 + $0xf0] sm:$0xff]  ;;  %v89_v10 = vld [vmem:[%s3141_s2 + $0xe8] sm:$0xff] }
   0x4   :  { %249 = vperm.xlu0 %1654, %v91_v2   ;;  %169 = vperm.xlu1 %1655, %v75_v3   ;;  %v39_v8 = vld [vmem:[%s3140_s1 + $0x58] sm:$0xff]  ;;  %v88_v11 = vld [vmem:[%s3141_s2 + $0xe0] sm:$0xff]  ;;  %v29_v12 = vld [vmem:[%s3140_s1 + $0x8] sm:$0xff] }
   0x5   :  { %164 = vperm.xlu2 %1656, %v74_v4   ;;  %1648 = vmatpush.xpose.msk.msra.mxu1 %vm252_vm0, %v27_v0  ;;  %v44_v13 = vld [vmem:[%s3140_s1 + $0x80] sm:$0xff]  ;;  %v51_v14 = vld [vmem:[%s3140_s1 + $0xb8] sm:$0xff] }
   0x6   :  { %1616 = vmatmul.msk.f32.vlgmr.msra.gmra.mxu0 %vm252_vm0, %v28_v5  ;;  %1631 = vmatmul.msk.f32.vlgmr.msra.gmra.mxu2 %vm252_vm0, %v43_v6 }
   0x7   :  { %1638 = vmatmul.msk.f32.vlgmr.msra.gmra.mxu3 %vm252_vm0, %v50_v7 }
   0x8   :  { %1627 = vmatmul.msk.f32.vlgmr.msra.gmra.mxu1 %vm252_vm0, %v39_v8 }
   0xc   :  { %244 = vperm.xlu0 %1654, %v90_v9   ;;  %239 = vperm.xlu1 %1655, %v89_v10  }
   0xd   :  { %12 = vsyncpa [#allocation3], 0  ;;  %234 = vperm.xlu2 %1656, %v88_v11   ;;  %v40_v15 = vld [vmem:[%s3140_s1 + $0x60] sm:$0xff]  ;;  %v87_v16 = vld [vmem:[%s3141_s2 + $0xd8] sm:$0xff]  ;;  %s1606_s8 = sshll.u32 %s3146_s7, 4  ;;  %vm1597_vm1 = vcmask 57344   ;;  %s1607_s8 = int_to_ptr.hbm [resolvable:$true] %s1606_s8 }
   0xe   :  { %1617 = vmatmul.msk.f32.gmra.mxu0 %vm252_vm0, %v29_v12  ;;  %1632 = vmatmul.msk.f32.gmra.mxu2 %vm252_vm0, %v44_v13  ;;  %v73_v17 = vld [vmem:[%s3141_s2 + $0x68] sm:$0xff]  ;;  %v72_v18 = vld [vmem:[%s3141_s2 + $0x60] sm:$0xff]  ;;  %v30_v19 = vld [vmem:[%s3140_s1 + $0x10] sm:$0xff] }
   0xf   :  { %1639 = vmatmul.msk.f32.gmra.mxu3 %vm252_vm0, %v51_v14  ;;  %v45_v20 = vld [vmem:[%s3140_s1 + $0x88] sm:$0xff]  ;;  %v52_v21 = vld [vmem:[%s3140_s1 + $0xc0] sm:$0xff]  ;;  %v86_v23 = vld [vmem:[%s3141_s2 + $0xd0] sm:$0xff] }
  0x10   :  { %1628 = vmatmul.msk.f32.gmra.mxu1 %vm252_vm0, %v40_v15  ;;  %v41_v22 = vld [vmem:[%s3140_s1 + $0x68] sm:$0xff]  ;;  %v71_v24 = vld [vmem:[%s3141_s2 + $0x58] sm:$0xff]  ;;  %v46_v27 = vld [vmem:[%s3140_s1 + $0x90] sm:$0xff] }
  0x11   :  { %v85_v25 = vld [vmem:[%s3141_s2 + $0xc8] sm:$0xff]  ;;  %v31_v26 = vld [vmem:[%s3140_s1 + $0x18] sm:$0xff]  ;;  %v42_v29 = vld [vmem:[%s3140_s1 + $0x70] sm:$0xff] }
  0x12   :  { %v53_v28 = vld [vmem:[%s3140_s1 + $0xc8] sm:$0xff]  ;;  %v84_v30 = vld [vmem:[%s3141_s2 + $0xc0] sm:$0xff]  ;;  %v70_v31 = vld [vmem:[%s3141_s2 + $0x50] sm:$0xff] }
  0x13   :  { %v69_v32 = vld [vmem:[%s3141_s2 + $0x48] sm:$0xff]  ;;  %v32_v33 = vld [vmem:[%s3140_s1 + $0x20] sm:$0xff]  ;;  %v47_v34 = vld [vmem:[%s3140_s1 + $0x98] sm:$0xff] }
  0x14   :  { %229 = vperm.xlu1 %1655, %v87_v16   ;;  %159 = vperm.xlu0 %1654, %v73_v17   ;;  %v54_v35 = vld [vmem:[%s3140_s1 + $0xd0] sm:$0xff]  ;;  %v83_v36 = vld [vmem:[%s3141_s2 + $0xb8] sm:$0xff]  ;;  %v68_v37 = vld [vmem:[%s3141_s2 + $0x40] sm:$0xff] }
  0x15   :  { %154 = vperm.xlu2 %1656, %v72_v18   ;;  %v82_v38 = vld [vmem:[%s3141_s2 + $0xb0] sm:$0xff]  ;;  %v33_v39 = vld [vmem:[%s3140_s1 + $0x28] sm:$0xff]  ;;  %v48_v40 = vld [vmem:[%s3140_s1 + $0xa0] sm:$0xff] }
  0x16   :  { %1618 = vmatmul.msk.f32.gmra.mxu0 %vm252_vm0, %v30_v19  ;;  %1633 = vmatmul.msk.f32.gmra.mxu2 %vm252_vm0, %v45_v20  ;;  %v55_v41 = vld [vmem:[%s3140_s1 + $0xd8] sm:$0xff]  ;;  %v81_v42 = vld [vmem:[%s3141_s2 + $0xa8] sm:$0xff]  ;;  %v66_v44 = vld [vmem:[%s3141_s2 + $0x30] sm:$0xff] }
  0x17   :  { %1640 = vmatmul.msk.f32.gmra.mxu3 %vm252_vm0, %v52_v21  ;;  %v67_v43 = vld [vmem:[%s3141_s2 + $0x38] sm:$0xff]  ;;  %v34_v45 = vld [vmem:[%s3140_s1 + $0x30] sm:$0xff]  ;;  %v49_v46 = vld [vmem:[%s3140_s1 + $0xa8] sm:$0xff] }
  0x18   :  { %1629 = vmatmul.msk.f32.gmra.mxu1 %vm252_vm0, %v41_v22  ;;  %v56_v47 = vld [vmem:[%s3140_s1 + $0xe0] sm:$0xff]  ;;  %v65_v49 = vld [vmem:[%s3141_s2 + $0x28] sm:$0xff]  ;;  %v79_v50 = vld [vmem:[%s3141_s2 + $0x98] sm:$0xff] }
  0x19   :  { %v80_v48 = vld [vmem:[%s3141_s2 + $0xa0] sm:$0xff]  ;;  %v35_v51 = vld [vmem:[%s3140_s1 + $0x38] sm:$0xff]  ;;  %v57_v52 = vld [vmem:[%s3140_s1 + $0xe8] sm:$0xff] }
  0x1a   :  { %v78_v53 = vld [vmem:[%s3141_s2 + $0x90] sm:$0xff]  ;;  %v64_v54 = vld [vmem:[%s3141_s2 + $0x20] sm:$0xff]  ;;  %v63_v55 = vld [vmem:[%s3141_s2 + $0x18] sm:$0xff] }
  0x1b   :  { %v36_v56 = vld [vmem:[%s3140_s1 + $0x40] sm:$0xff]  ;;  %v58_v57 = vld [vmem:[%s3140_s1 + $0xf0] sm:$0xff]  ;;  %v77_v58 = vld [vmem:[%s3141_s2 + $0x88] sm:$0xff] }
  0x1c   :  { %224 = vperm.xlu0 %1654, %v86_v23   ;;  %149 = vperm.xlu1 %1655, %v71_v24   ;;  %v62_v59 = vld [vmem:[%s3141_s2 + $0x10] sm:$0xff]  ;;  %v76_v60 = vld [vmem:[%s3141_s2 + $0x80] sm:$0xff]  ;;  %v37_v61 = vld [vmem:[%s3140_s1 + $0x48] sm:$0xff] }
  0x1d   :  { %219 = vperm.xlu2 %1656, %v85_v25   ;;  %v59_v62 = vld [vmem:[%s3140_s1 + $0xf8] sm:$0xff]  ;;  %v61_v63 = vld [vmem:[%s3141_s2 + $0x8] sm:$0xff]  ;;  %v60_v0 = vld [vmem:[%s3141_s2] sm:$0xff] }
  0x1e   :  { %1619 = vmatmul.msk.f32.gmra.mxu0 %vm252_vm0, %v31_v26  ;;  %1634 = vmatmul.msk.f32.gmra.mxu2 %vm252_vm0, %v46_v27  ;;  %v576_v1 = vld [vmem:[%s3143_s4 + $0x78] sm:$0xff]  ;;  %v38_v2 = vld [vmem:[%s3140_s1 + $0x50] sm:$0xff]  ;;  %v574_v4 = vld [vmem:[%s3143_s4 + $0x68] sm:$0xff] }
  0x1f   :  { %1641 = vmatmul.msk.f32.gmra.mxu3 %vm252_vm0, %v53_v28  ;;  %v575_v3 = vld [vmem:[%s3143_s4 + $0x70] sm:$0xff]  ;;  %v573_v5 = vld [vmem:[%s3143_s4 + $0x60] sm:$0xff]  ;;  %v572_v6 = vld [vmem:[%s3143_s4 + $0x58] sm:$0xff] }
  0x20   :  { %1630 = vmatmul.msk.f32.gmra.mxu1 %vm252_vm0, %v42_v29  ;;  %v592_v7 = vld [vmem:[%s3143_s4 + $0xf8] sm:$0xff]  ;;  %v571_v8 = vld [vmem:[%s3143_s4 + $0x50] sm:$0xff]  ;;  %v570_v10 = vld [vmem:[%s3143_s4 + $0x48] sm:$0xff] }
  0x21   :  { %v591_v9 = vld [vmem:[%s3143_s4 + $0xf0] sm:$0xff]  ;;  %v590_v11 = vld [vmem:[%s3143_s4 + $0xe8] sm:$0xff]  ;;  %v569_v12 = vld [vmem:[%s3143_s4 + $0x40] sm:$0xff] }
  0x22   :  { %v589_v13 = vld [vmem:[%s3143_s4 + $0xe0] sm:$0xff]  ;;  %v568_v14 = vld [vmem:[%s3143_s4 + $0x38] sm:$0xff]  ;;  %v567_v16 = vld [vmem:[%s3143_s4 + $0x30] sm:$0xff] }
  0x23   :  { %v588_v15 = vld [vmem:[%s3143_s4 + $0xd8] sm:$0xff]  ;;  %v587_v17 = vld [vmem:[%s3143_s4 + $0xd0] sm:$0xff]  ;;  %v566_v20 = vld [vmem:[%s3143_s4 + $0x28] sm:$0xff] }
  0x24   :  { %214 = vperm.xlu1 %1655, %v84_v30   ;;  %144 = vperm.xlu0 %1654, %v70_v31   ;;  %v586_v21 = vld [vmem:[%s3143_s4 + $0xc8] sm:$0xff]  ;;  %v565_v22 = vld [vmem:[%s3143_s4 + $0x20] sm:$0xff]  ;;  %v564_v29 = vld [vmem:[%s3143_s4 + $0x18] sm:$0xff] }
  0x25   :  { %139 = vperm.xlu2 %1656, %v69_v32   ;;  %v585_v28 = vld [vmem:[%s3143_s4 + $0xc0] sm:$0xff]  ;;  %v584_v32 = vld [vmem:[%s3143_s4 + $0xb8] sm:$0xff] }
  0x26   :  { %1620 = vmatmul.msk.f32.gmra.mxu0 %vm252_vm0, %v32_v33  ;;  %1635 = vmatmul.msk.f32.gmra.mxu2 %vm252_vm0, %v47_v34 }
  0x27   :  { %1642 = vmatmul.msk.f32.gmra.mxu3 %vm252_vm0, %v54_v35 }
  0x2c   :  { %209 = vperm.xlu0 %1654, %v83_v36   ;;  %134 = vperm.xlu1 %1655, %v68_v37   ;;  %v563_v36 = vld [vmem:[%s3143_s4 + $0x10] sm:$0xff] }
  0x2d   :  { %204 = vperm.xlu2 %1656, %v82_v38   ;;  %v583_v37 = vld [vmem:[%s3143_s4 + $0xb0] sm:$0xff] }
  0x2e   :  { %1621 = vmatmul.msk.f32.gmra.mxu0 %vm252_vm0, %v33_v39  ;;  %1636 = vmatmul.msk.f32.gmra.mxu2 %vm252_vm0, %v48_v40 }
  0x2f   :  { %1643 = vmatmul.msk.f32.gmra.mxu3 %vm252_vm0, %v55_v41  ;;  %v562_v41 = vld [vmem:[%s3143_s4 + $0x8] sm:$0xff] }
  0x34   :  { %199 = vperm.xlu1 %1655, %v81_v42   ;;  %129 = vperm.xlu0 %1654, %v67_v43  }
  0x35   :  { %124 = vperm.xlu2 %1656, %v66_v44  }
  0x36   :  { %1622 = vmatmul.msk.f32.gmra.mxu0 %vm252_vm0, %v34_v45  ;;  %1637 = vmatmul.msk.f32.gmra.mxu2 %vm252_vm0, %v49_v46  ;;  %v582_v46 = vld [vmem:[%s3143_s4 + $0xa8] sm:$0xff] }
  0x37   :  { %1644 = vmatmul.msk.f32.gmra.mxu3 %vm252_vm0, %v56_v47  ;;  %v561_v47 = vld [vmem:[%s3143_s4] sm:$0xff] }
  0x3c   :  { %194 = vperm.xlu0 %1654, %v80_v48   ;;  %119 = vperm.xlu1 %1655, %v65_v49   ;;  %v581_v49 = vld [vmem:[%s3143_s4 + $0xa0] sm:$0xff] }
  0x3d   :  { %189 = vperm.xlu2 %1656, %v79_v50  }
  0x3e   :  { %1623 = vmatmul.msk.f32.gmra.mxu0 %vm252_vm0, %v35_v51 }
  0x3f   :  { %1645 = vmatmul.msk.f32.gmra.mxu3 %vm252_vm0, %v57_v52 }
  0x44   :  { %184 = vperm.xlu1 %1655, %v78_v53   ;;  %114 = vperm.xlu0 %1654, %v64_v54  }
  0x45   :  { %109 = vperm.xlu2 %1656, %v63_v55  }
  0x46   :  { %1624 = vmatmul.msk.f32.gmra.mxu0 %vm252_vm0, %v36_v56 }
  0x47   :  { %1646 = vmatmul.msk.f32.gmra.mxu3 %vm252_vm0, %v58_v57 }
  0x4c   :  { %179 = vperm.xlu0 %1654, %v77_v58   ;;  %104 = vperm.xlu1 %1655, %v62_v59   ;;  %v580_v59 = vld [vmem:[%s3143_s4 + $0x98] sm:$0xff] }
  0x4d   :  { %174 = vperm.xlu2 %1656, %v76_v60   ;;  %v579_v60 = vld [vmem:[%s3143_s4 + $0x90] sm:$0xff] }
  0x4e   :  { %1625 = vmatmul.msk.f32.gmra.mxu0 %vm252_vm0, %v37_v61 }
  0x4f   :  { %1647 = vmatmul.msk.f32.gmra.mxu3 %vm252_vm0, %v59_v62  ;;  %v578_v62 = vld [vmem:[%s3143_s4 + $0x88] sm:$0xff] }
  0x54   :  { %99 = vperm.xlu0 %1654, %v61_v63   ;;  %94 = vperm.xlu1 %1655, %v60_v0  }
  0x55   :  { %670 = vperm.xlu2 %1656, %v576_v1  }
  0x56   :  { %1626 = vmatmul.msk.f32.gmra.mxu0 %vm252_vm0, %v38_v2 }
  0x5c   :  { %665 = vperm.xlu0 %1654, %v575_v3   ;;  %660 = vperm.xlu1 %1655, %v574_v4  }
  0x5d   :  { %655 = vperm.xlu2 %1656, %v573_v5   ;;  %v577_v5 = vld [vmem:[%s3143_s4 + $0x80] sm:$0xff] }
  0x5f   :  { %v165_v25 = vpop.permute.xlu2 %164 }
  0x64   :  { %650 = vperm.xlu0 %1654, %v572_v6   ;;  %750 = vperm.xlu1 %1655, %v592_v7   ;;  %v1106_v6 = vld [vmem:[%s3145_s6 + $0xf8] sm:$0xff] }
  0x65   :  { %645 = vperm.xlu2 %1656, %v571_v8  }
  0x67   :  { %v2233_v39 = vpop.permute.xlu2 %234 }
  0x6c   :  { %745 = vperm.xlu0 %1654, %v591_v9   ;;  %640 = vperm.xlu1 %1655, %v570_v10   ;;  %v1105_v9 = vld [vmem:[%s3145_s6 + $0xf0] sm:$0xff] }
  0x6d   :  { %740 = vperm.xlu2 %1656, %v590_v11  }
  0x6f   :  { %v155_v52 = vpop.permute.xlu2 %154 }
  0x74   :  { %635 = vperm.xlu0 %1654, %v569_v12   ;;  %735 = vperm.xlu1 %1655, %v589_v13  }
  0x75   :  { %630 = vperm.xlu2 %1656, %v568_v14   ;;  %v1104_v14 = vld [vmem:[%s3145_s6 + $0xe8] sm:$0xff] }
  0x76   :  { %v2197_v18 = vpop.permute.xlu0 %249  ;;  %v170_v19 = vpop.permute.xlu1 %169 }
  0x77   :  { %v2289_v11 = vpop.permute.xlu2 %219 }
  0x7c   :  { %730 = vperm.xlu0 %1654, %v588_v15   ;;  %625 = vperm.xlu1 %1655, %v567_v16   ;;  %v1090_v15 = vld [vmem:[%s3145_s6 + $0x78] sm:$0xff] }
  0x7d   :  { %725 = vperm.xlu2 %1656, %v587_v17   ;;  %v1103_v17 = vld [vmem:[%s3145_s6 + $0xe0] sm:$0xff] }
  0x7e   :  { %v2210_v26 = vpop.permute.xlu0 %244  ;;  %v2223_v33 = vpop.permute.xlu1 %239 }
  0x83   :  { %v2208_v23 = vpop.f32.mrf.mxu0 }
  0x84   :  { %620 = vperm.xlu0 %1654, %v566_v20   ;;  %720 = vperm.xlu1 %1655, %v586_v21   ;;  %v140_v21 = vpop.permute.xlu2 %139 }
  0x85   :  { %615 = vperm.xlu2 %1656, %v565_v22   ;;  %v402_v24 = vpop.f32.mrf.mxu1  ;;  %v1089_v22 = vld [vmem:[%s3145_s6 + $0x70] sm:$0xff] }
  0x86   :  { %v160_v42 = vpop.permute.xlu0 %159  ;;  %v2242_v44 = vpop.permute.xlu1 %229 }
  0x89   :  { %v414_v27 = vpop.f32.mrf.mxu2 }
  0x8a   :  { %v415_v30 = vadd.f32 %v414_v27, %v170_v19  ;;  %v2218_v31 = vpop.f32.mrf.mxu3 }
  0x8b   :  { %v2225_v34 = vpop.f32.mrf.mxu0 }
  0x8c   :  { %1657 = vtanh.f32 %v415_v30  ;;  %715 = vperm.xlu0 %1654, %v585_v28   ;;  %610 = vperm.xlu1 %1655, %v564_v29   ;;  %v1088_v28 = vld [vmem:[%s3145_s6 + $0x68] sm:$0xff] }
  0x8d   :  { %710 = vperm.xlu2 %1656, %v584_v32   ;;  %v405_v35 = vpop.f32.mrf.mxu1 }
  0x8e   :  { %v2257_v53 = vpop.permute.xlu0 %224  ;;  %v406_v55 = vadd.f32 %v405_v35, %v155_v52  ;;  %v150_v57 = vpop.permute.xlu1 %149  ;;  %v1101_v35 = vld [vmem:[%s3145_s6 + $0xd0] sm:$0xff] }
  0x8f   :  { %v403_v58 = vadd.f32 %v402_v24, %v150_v57  ;;  %v1102_v24 = vld [vmem:[%s3145_s6 + $0xd8] sm:$0xff] }
  0x91   :  { %v2291_v12 = vpop.f32.mrf.mxu2 }
  0x92   :  { %v1658_v38 = vpop.eup %1657  ;;  %v2235_v40 = vpop.f32.mrf.mxu3 }
  0x93   :  { %v2240_v43 = vpop.f32.mrf.mxu0  ;;  %753 = vmatpush.msrb.mxu1 %v1658_v38 }
  0x94   :  { %605 = vperm.xlu0 %1654, %v563_v36   ;;  %705 = vperm.xlu1 %1655, %v583_v37   ;;  %v1087_v36 = vld [vmem:[%s3145_s6 + $0x60] sm:$0xff]  ;;  %v2327_v37 = vpop.permute.xlu2 %204 }
  0x95   :  { %600 = vperm.xlu2 %1656, %v562_v41   ;;  %v408_v45 = vpop.f32.mrf.mxu1  ;;  %v1100_v41 = vld [vmem:[%s3145_s6 + $0xc8] sm:$0xff] }
  0x96   :  { %v409_v50 = vadd.f32 %v408_v45, %v160_v42  ;;  %v2272_v2 = vpop.permute.xlu0 %144  ;;  %v2274_v4 = vpop.permute.xlu1 %214 }
  0x98   :  { %1659 = vtanh.f32 %v409_v50  ;;  %v1099_v50 = vld [vmem:[%s3145_s6 + $0xc0] sm:$0xff] }
  0x9a   :  { %v2250_v48 = vpop.f32.mrf.mxu3 }
  0x9b   :  { %v2255_v51 = vpop.f32.mrf.mxu0 }
  0x9c   :  { %700 = vperm.xlu0 %1654, %v582_v46   ;;  %595 = vperm.xlu1 %1655, %v561_v47  }
  0x9d   :  { %695 = vperm.xlu2 %1656, %v581_v49   ;;  %v411_v54 = vpop.f32.mrf.mxu1  ;;  %v1086_v49 = vld [vmem:[%s3145_s6 + $0x58] sm:$0xff] }
  0x9e   :  { %v412_v56 = vadd.f32 %v411_v54, %v165_v25  ;;  %v1660_v0 = vpop.eup %1659  ;;  %v2293_v13 = vpop.permute.xlu0 %209  ;;  %v1085_v54 = vld [vmem:[%s3145_s6 + $0x50] sm:$0xff] }
  0x9f   :  { %v135_v19 = vpop.permute.xlu1 %134  ;;  %v2314_v25 = vpop.f32.mrf.mxu2 }
  0xa0   :  { %1661 = vtanh.f32 %v412_v56  ;;  %v125_v56 = vpop.permute.xlu2 %124 }
  0xa1   :  { %1663 = vtanh.f32 %v406_v55 }
  0xa2   :  { %v2265_v61 = vpop.f32.mrf.mxu3  ;;  %1665 = vtanh.f32 %v403_v58 }
  0xa3   :  { %v2270_v63 = vpop.f32.mrf.mxu0 }
  0xa4   :  { %690 = vperm.xlu0 %1654, %v580_v59   ;;  %685 = vperm.xlu1 %1655, %v579_v60   ;;  %v1098_v60 = vld [vmem:[%s3145_s6 + $0xb8] sm:$0xff] }
  0xa5   :  { %680 = vperm.xlu2 %1656, %v578_v62   ;;  %v1084_v62 = vld [vmem:[%s3145_s6 + $0x48] sm:$0xff] }
  0xa6   :  { %v1662_v1 = vpop.eup %1661  ;;  %v130_v29 = vpop.permute.xlu0 %129 }
  0xa7   :  { %754 = vmatpush.msrb.mxu1 %v1662_v1  ;;  %v1664_v3 = vpop.eup %1663  ;;  %v2319_v32 = vpop.permute.xlu1 %199  ;;  %v1097_v1 = vld [vmem:[%s3145_s6 + $0xb0] sm:$0xff] }
  0xa8   :  { %v1666_v7 = vpop.eup %1665  ;;  %v2332_v45 = vpop.f32.mrf.mxu2 }
  0xa9   :  { %755 = vmatpush.msrb.mxu1 %v1660_v0 }
  0xaa   :  { %v2282_v8 = vpop.f32.mrf.mxu3 }
  0xab   :  { %v2287_v10 = vpop.f32.mrf.mxu0  ;;  %756 = vmatpush.msrb.mxu1 %v1664_v3 }
  0xac   :  { %675 = vperm.xlu0 %1654, %v577_v5   ;;  %1264 = vperm.xlu1 %1655, %v1106_v6  }
  0xad   :  { %1259 = vperm.xlu2 %1656, %v1105_v9   ;;  %757 = vmatpush.msrb.mxu1 %v1666_v7 }
  0xae   :  { %v2334_v46 = vpop.permute.xlu0 %194 }
  0xaf   :  { %v120_v47 = vpop.permute.xlu1 %119 }
  0xb0   :  { %v2345_v57 = vpop.f32.mrf.mxu2 }
  0xb2   :  { %v2301_v16 = vpop.f32.mrf.mxu3 }
  0xb3   :  { %v2306_v20 = vpop.f32.mrf.mxu0 }
  0xb4   :  { %1254 = vperm.xlu0 %1654, %v1104_v14   ;;  %1184 = vperm.xlu1 %1655, %v1090_v15   ;;  %v2362_v15 = vpop.permute.xlu2 %189 }
  0xb5   :  { %1249 = vperm.xlu2 %1656, %v1103_v17  }
  0xb6   :  { %v115_v58 = vpop.permute.xlu0 %114 }
  0xb7   :  { %v2347_v59 = vpop.permute.xlu1 %184 }
  0xba   :  { %v453_v27 = vpop.f32.mrf.mxu3 }
  0xbb   :  { %v390_v30 = vpop.f32.mrf.mxu0  ;;  %v454_v17 = vadd.f32 %v453_v27, %v2233_v39  ;;  %v1082_v39 = vld [vmem:[%s3145_s6 + $0x38] sm:$0xff] }
  0xbc   :  { %1179 = vperm.xlu0 %1654, %v1089_v22   ;;  %1244 = vperm.xlu1 %1655, %v1102_v24  }
  0xbd   :  { %1174 = vperm.xlu2 %1656, %v1088_v28   ;;  %v448_v28 = vadd.f32 %v2282_v8, %v2257_v53  ;;  %v442_v8 = vadd.f32 %v2250_v48, %v2274_v4  ;;  %v1094_v48 = vld [vmem:[%s3145_s6 + $0x98] sm:$0xff] }
  0xc2   :  { %v456_v38 = vpop.f32.mrf.mxu3 }
  0xc3   :  { %v393_v42 = vpop.f32.mrf.mxu0  ;;  %v457_v7 = vadd.f32 %v456_v38, %v2223_v33  ;;  %v391_v33 = vadd.f32 %v390_v30, %v130_v29  ;;  %v385_v30 = vadd.f32 %v2287_v10, %v120_v47  ;;  %v382_v38 = vadd.f32 %v2270_v63, %v115_v58  ;;  %v1095_v63 = vld [vmem:[%s3145_s6 + $0xa0] sm:$0xff] }
  0xc4   :  { %1239 = vperm.xlu0 %1654, %v1101_v35   ;;  %1169 = vperm.xlu1 %1655, %v1087_v36   ;;  %v394_v22 = vadd.f32 %v393_v42, %v135_v19  ;;  %v1096_v19 = vld [vmem:[%s3145_s6 + $0xa8] sm:$0xff]  ;;  %v445_v36 = vadd.f32 %v2265_v61, %v2289_v11  ;;  %v439_v61 = vadd.f32 %v2235_v40, %v2293_v13  ;;  %v1081_v40 = vld [vmem:[%s3145_s6 + $0x30] sm:$0xff] }
  0xc5   :  { %1234 = vperm.xlu2 %1656, %v1100_v41   ;;  %v110_v41 = vpop.permute.xlu2 %109 }
  0xc6   :  { %v379_v42 = vadd.f32 %v2255_v51, %v110_v41  ;;  %v436_v51 = vadd.f32 %v2218_v31, %v2327_v37  ;;  %v510_v41 = vld [vmem:[%s3142_s3 + $0x68] sm:$0xff] }
  0xca   :  { %v459_v52 = vpop.f32.mrf.mxu3 }
  0xcb   :  { %v396_v55 = vpop.f32.mrf.mxu0  ;;  %v460_v3 = vadd.f32 %v459_v52, %v2210_v26  ;;  %v2365_v26 = vpop.f32.mrf.mxu2 }
  0xcc   :  { %1164 = vperm.xlu0 %1654, %v1086_v49   ;;  %1229 = vperm.xlu1 %1655, %v1099_v50   ;;  %v397_v14 = vadd.f32 %v396_v55, %v140_v21  ;;  %v1083_v21 = vld [vmem:[%s3145_s6 + $0x40] sm:$0xff] }
  0xcd   :  { %1159 = vperm.xlu2 %1656, %v1085_v54  }
  0xd2   :  { %v462_v0 = vpop.f32.mrf.mxu3 }
  0xd3   :  { %v463_v5 = vadd.f32 %v462_v0, %v2197_v18  ;;  %v399_v6 = vpop.f32.mrf.mxu0  ;;  %v451_v18 = vadd.f32 %v2301_v16, %v2242_v44  ;;  %v388_v44 = vadd.f32 %v2306_v20, %v125_v56  ;;  %v105_v16 = vpop.permute.xlu1 %104  ;;  %v1093_v0 = vld [vmem:[%s3145_s6 + $0x90] sm:$0xff] }
  0xd4   :  { %v400_v9 = vadd.f32 %v399_v6, %v2272_v2  ;;  %1224 = vperm.xlu0 %1654, %v1098_v60   ;;  %1154 = vperm.xlu1 %1655, %v1084_v62   ;;  %v2369_v2 = vpop.permute.xlu0 %179  ;;  %v432_v11 = vpop.f32.mrf.mxu2  ;;  %v376_v13 = vadd.f32 %v2240_v43, %v105_v16  ;;  %v430_v43 = vadd.f32 %v2365_v26, %v2334_v46  ;;  %v1079_v62 = vld [vmem:[%s3145_s6 + $0x20] sm:$0xff] }
  0xd5   :  { %1667 = vtanh.f32 %v463_v5  ;;  %1219 = vperm.xlu2 %1656, %v1097_v1   ;;  %v433_v52 = vadd.f32 %v432_v11, %v2319_v32  ;;  %v175_v5 = vpop.permute.xlu2 %174  ;;  %v501_v16 = vld [vmem:[%s3142_s3 + $0x20] sm:$0xff] }
  0xd6   :  { %1669 = vtanh.f32 %v400_v9  ;;  %v517_v11 = vld [vmem:[%s3142_s3 + $0xa0] sm:$0xff] }
  0xd7   :  { %1671 = vtanh.f32 %v460_v3 }
  0xd8   :  { %1673 = vtanh.f32 %v457_v7  ;;  %v421_v7 = vadd.f32 %v2314_v25, %v2369_v2  ;;  %v1091_v25 = vld [vmem:[%s3145_s6 + $0x80] sm:$0xff]  ;;  %v499_v2 = vld [vmem:[%s3142_s3 + $0x10] sm:$0xff] }
  0xd9   :  { %1675 = vtanh.f32 %v397_v14 }
  0xda   :  { %1677 = vtanh.f32 %v454_v17 }
  0xdb   :  { %v1668_v24 = vpop.eup %1667  ;;  %1679 = vtanh.f32 %v394_v22  ;;  %v95_v54 = vpop.permute.xlu1 %94  ;;  %v1078_v22 = vld [vmem:[%s3145_s6 + $0x18] sm:$0xff] }
  0xdc   :  { %v1670_v27 = vpop.eup %1669  ;;  %1681 = vtanh.f32 %v451_v18  ;;  %866 = vmatpush.msrb.mxu2 %v1668_v24  ;;  %1149 = vperm.xlu0 %1654, %v1083_v21   ;;  %v100_v49 = vpop.permute.xlu0 %99  ;;  %v370_v58 = vadd.f32 %v2208_v23, %v95_v54  ;;  %v1080_v23 = vld [vmem:[%s3145_s6 + $0x28] sm:$0xff]  ;;  %v1077_v24 = vld [vmem:[%s3145_s6 + $0x10] sm:$0xff] }
  0xdd   :  { %v1672_v29 = vpop.eup %1671  ;;  %1683 = vtanh.f32 %v391_v33  ;;  %1144 = vperm.xlu2 %1656, %v1082_v39   ;;  %1214 = vperm.xlu1 %1655, %v1096_v19   ;;  %v373_v31 = vadd.f32 %v2225_v34, %v100_v49  ;;  %v427_v34 = vadd.f32 %v2345_v57, %v2362_v15  ;;  %v424_v57 = vadd.f32 %v2332_v45, %v2347_v59  ;;  %v497_v59 = vld [vmem:[%s3142_s3] sm:$0xff]  ;;  %v498_v21 = vld [vmem:[%s3142_s3 + $0x8] sm:$0xff]  ;;  %v520_v49 = vld [vmem:[%s3142_s3 + $0xb8] sm:$0xff] }
  0xde   :  { %v1674_v35 = vpop.eup %1673  ;;  %758 = vmatpush.msrb.mxu1 %v1670_v27  ;;  %867 = vmatpush.msrb.mxu2 %v1672_v29  ;;  %1685 = vtanh.f32 %v388_v44  ;;  %v418_v15 = vadd.f32 %v2291_v12, %v175_v5  ;;  %v1092_v12 = vld [vmem:[%s3145_s6 + $0x88] sm:$0xff]  ;;  %v1075_v19 = vld [vmem:[%s3145_s6] sm:$0xff]  ;;  %v500_v27 = vld [vmem:[%s3142_s3 + $0x18] sm:$0xff] }
  0xdf   :  { %v1676_v20 = vpop.eup %1675  ;;  %1687 = vtanh.f32 %v448_v28  ;;  %v1076_v44 = vld [vmem:[%s3145_s6 + $0x8] sm:$0xff]  ;;  %v503_v28 = vld [vmem:[%s3142_s3 + $0x30] sm:$0xff] }
  0xe0   :  { %v1678_v53 = vpop.eup %1677  ;;  %759 = vmatpush.msrb.mxu1 %v1676_v20  ;;  %868 = vmatpush.msrb.mxu2 %v1674_v35  ;;  %1689 = vtanh.f32 %v385_v30  ;;  %v502_v29 = vld [vmem:[%s3142_s3 + $0x28] sm:$0xff]  ;;  %v505_v30 = vld [vmem:[%s3142_s3 + $0x40] sm:$0xff]  ;;  %v504_v35 = vld [vmem:[%s3142_s3 + $0x38] sm:$0xff] }
  0xe1   :  { %v1680_v10 = vpop.eup %1679  ;;  %1691 = vtanh.f32 %v445_v36  ;;  %v507_v36 = vld [vmem:[%s3142_s3 + $0x50] sm:$0xff]  ;;  %v506_v20 = vld [vmem:[%s3142_s3 + $0x48] sm:$0xff] }
  0xe2   :  { %v1682_v47 = vpop.eup %1681  ;;  %760 = vmatpush.msrb.mxu1 %v1680_v10  ;;  %869 = vmatpush.msrb.mxu2 %v1678_v53  ;;  %1693 = vtanh.f32 %v382_v38  ;;  %v509_v38 = vld [vmem:[%s3142_s3 + $0x60] sm:$0xff]  ;;  %v508_v53 = vld [vmem:[%s3142_s3 + $0x58] sm:$0xff]  ;;  %v527_v54 = vld [vmem:[%s3142_s3 + $0xf0] sm:$0xff] }
  0xe3   :  { %v1684_v4 = vpop.eup %1683  ;;  %1695 = vtanh.f32 %v442_v8  ;;  %v511_v8 = vld [vmem:[%s3142_s3 + $0x70] sm:$0xff]  ;;  %v513_v10 = vld [vmem:[%s3142_s3 + $0x80] sm:$0xff] }
  0xe4   :  { %761 = vmatpush.msrb.mxu1 %v1684_v4  ;;  %870 = vmatpush.msrb.mxu2 %v1682_v47  ;;  %v1686_v50 = vpop.eup %1685  ;;  %1697 = vtanh.f32 %v379_v42  ;;  %v512_v42 = vld [vmem:[%s3142_s3 + $0x78] sm:$0xff]  ;;  %v515_v47 = vld [vmem:[%s3142_s3 + $0x90] sm:$0xff]  ;;  %v518_v4 = vld [vmem:[%s3142_s3 + $0xa8] sm:$0xff] }
  0xe5   :  { %1204 = vperm.xlu2 %1656, %v1094_v48   ;;  %1209 = vperm.xlu0 %1654, %v1095_v63   ;;  %v1688_v55 = vpop.eup %1687  ;;  %1699 = vtanh.f32 %v439_v61  ;;  %v514_v61 = vld [vmem:[%s3142_s3 + $0x88] sm:$0xff]  ;;  %v516_v48 = vld [vmem:[%s3142_s3 + $0x98] sm:$0xff]  ;;  %v519_v63 = vld [vmem:[%s3142_s3 + $0xb0] sm:$0xff] }
  0xe6   :  { %1139 = vperm.xlu1 %1655, %v1081_v40   ;;  %762 = vmatpush.msrb.mxu1 %v1686_v50  ;;  %v1690_v37 = vpop.eup %1689  ;;  %1701 = vtanh.f32 %v436_v51  ;;  %v521_v51 = vld [vmem:[%s3142_s3 + $0xc0] sm:$0xff]  ;;  %v523_v40 = vld [vmem:[%s3142_s3 + $0xd0] sm:$0xff] }
  0xe7   :  { %871 = vmatpush.msrb.mxu2 %v1688_v55  ;;  %v1692_v56 = vpop.eup %1691  ;;  %1703 = vtanh.f32 %v376_v13  ;;  %v522_v13 = vld [vmem:[%s3142_s3 + $0xc8] sm:$0xff]  ;;  %v525_v50 = vld [vmem:[%s3142_s3 + $0xe0] sm:$0xff] }
  0xe8   :  { %763 = vmatpush.msrb.mxu1 %v1690_v37  ;;  %v1694_v32 = vpop.eup %1693  ;;  %1705 = vtanh.f32 %v433_v52  ;;  %v524_v52 = vld [vmem:[%s3142_s3 + $0xd8] sm:$0xff]  ;;  %v526_v55 = vld [vmem:[%s3142_s3 + $0xe8] sm:$0xff]  ;;  %v529_v37 = vld [vmem:[%s3142_s3 + $0x100] sm:$0xff] }
  0xe9   :  { %872 = vmatpush.msrb.mxu2 %v1692_v56  ;;  %v1696_v60 = vpop.eup %1695  ;;  %1707 = vtanh.f32 %v373_v31 }
  0xea   :  { %764 = vmatpush.msrb.mxu1 %v1694_v32  ;;  %v1698_v46 = vpop.eup %1697  ;;  %1709 = vtanh.f32 %v430_v43  ;;  %v528_v43 = vld [vmem:[%s3142_s3 + $0xf8] sm:$0xff]  ;;  %v530_v32 = vld [vmem:[%s3142_s3 + $0x108] sm:$0xff] }
  0xeb   :  { %873 = vmatpush.msrb.mxu2 %v1696_v60  ;;  %v1700_v1 = vpop.eup %1699  ;;  %1711 = vtanh.f32 %v370_v58  ;;  %v531_v58 = vld [vmem:[%s3142_s3 + $0x110] sm:$0xff] }
  0xec   :  { %765 = vmatpush.msrb.mxu1 %v1698_v46  ;;  %v1702_v3 = vpop.eup %1701  ;;  %1713 = vtanh.f32 %v427_v34  ;;  %v532_v46 = vld [vmem:[%s3142_s3 + $0x118] sm:$0xff] }
  0xed   :  { %874 = vmatpush.msrb.mxu2 %v1700_v1  ;;  %1129 = vperm.xlu2 %1656, %v1079_v62   ;;  %v1704_v6 = vpop.eup %1703  ;;  %1715 = vtanh.f32 %v424_v57  ;;  %v533_v62 = vld [vmem:[%s3142_s3 + $0x120] sm:$0xff]  ;;  %v535_v1 = vld [vmem:[%s3142_s3 + $0x130] sm:$0xff]  ;;  %v534_v57 = vld [vmem:[%s3142_s3 + $0x128] sm:$0xff] }
  0xee   :  { %1134 = vperm.xlu0 %1654, %v1080_v23   ;;  %1199 = vperm.xlu1 %1655, %v1093_v0   ;;  %v1706_v9 = vpop.eup %1705  ;;  %1717 = vtanh.f32 %v421_v7  ;;  %v536_v7 = vld [vmem:[%s3142_s3 + $0x138] sm:$0xff] }
  0xef   :  { %766 = vmatpush.msrb.mxu1 %v1704_v6  ;;  %875 = vmatpush.msrb.mxu2 %v1702_v3  ;;  %v1708_v14 = vpop.eup %1707  ;;  %1719 = vtanh.f32 %v418_v15  ;;  %v537_v6 = vld [vmem:[%s3142_s3 + $0x140] sm:$0xff] }
  0xf0   :  { %v1710_v45 = vpop.eup %1709 }
  0xf1   :  { %767 = vmatpush.msrb.mxu1 %v1708_v14  ;;  %876 = vmatpush.msrb.mxu2 %v1706_v9  ;;  %v1712_v17 = vpop.eup %1711  ;;  %v2584_v14 = vpop.permute.xlu0 %665 }
  0xf2   :  { %v1714_v26 = vpop.eup %1713 }
  0xf3   :  { %768 = vmatpush.msrb.mxu1 %v1712_v17  ;;  %877 = vmatpush.msrb.mxu2 %v1710_v45  ;;  %v1716_v18 = vpop.eup %1715  ;;  %v539_v45 = vld [vmem:[%s3142_s3 + $0x150] sm:$0xff] }
  0xf4   :  { %769 = vmatmul.f32.vlgmr.msrb.gmra.mxu1 %v497_v59  ;;  %v1718_v33 = vpop.eup %1717  ;;  %v538_v59 = vld [vmem:[%s3142_s3 + $0x148] sm:$0xff] }
  0xf5   :  { %878 = vmatpush.msrb.mxu2 %v1714_v26  ;;  %1189 = vperm.xlu2 %1656, %v1091_v25   ;;  %v1720_v39 = vpop.eup %1719  ;;  %v2596_v25 = vpop.permute.xlu2 %670  ;;  %v540_v26 = vld [vmem:[%s3142_s3 + $0x158] sm:$0xff] }
  0xf6   :  { %1194 = vperm.xlu0 %1654, %v1092_v12   ;;  %1124 = vperm.xlu1 %1655, %v1078_v22   ;;  %v541_v22 = vld [vmem:[%s3142_s3 + $0x160] sm:$0xff] }
  0xf7   :  { %879 = vmatpush.msrb.mxu2 %v1716_v18 }
  0xf9   :  { %880 = vmatpush.msrb.mxu2 %v1718_v33  ;;  %v2606_v18 = vpop.permute.xlu0 %650 }
  0xfb   :  { %881 = vmatpush.msrb.mxu2 %v1720_v39  ;;  %v542_v39 = vld [vmem:[%s3142_s3 + $0x168] sm:$0xff] }
  0xfc   :  { %772 = vmatmul.f32.gmra.mxu1 %v499_v2  ;;  %882 = vmatmul.f32.vlgmr.msrb.gmra.mxu2 %v498_v21  ;;  %v543_v21 = vld [vmem:[%s3142_s3 + $0x170] sm:$0xff] }
  0xfd   :  { %1109 = vperm.xlu2 %1656, %v1075_v19   ;;  %v2618_v19 = vpop.permute.xlu2 %655 }
  0xfe   :  { %1119 = vperm.xlu0 %1654, %v1077_v24   ;;  %1114 = vperm.xlu1 %1655, %v1076_v44  }
 0x101   :  { %v2620_v24 = vpop.permute.xlu0 %745 }
 0x102   :  { %3147 = vst [vmem:[#allocation5_spill] sm:$0xff] %v2620_v24 }
 0x104   :  { %775 = vmatmul.f32.gmra.mxu1 %v501_v16  ;;  %885 = vmatmul.f32.gmra.mxu2 %v500_v27  ;;  %v545_v27 = vld [vmem:[%s3142_s3 + $0x180] sm:$0xff] }
 0x10c   :  { %778 = vmatmul.f32.gmra.mxu1 %v503_v28  ;;  %888 = vmatmul.f32.gmra.mxu2 %v502_v29  ;;  %v544_v28 = vld [vmem:[%s3142_s3 + $0x178] sm:$0xff]  ;;  %v2632_v29 = vpop.permute.xlu1 %660 }
 0x114   :  { %781 = vmatmul.f32.gmra.mxu1 %v505_v30  ;;  %891 = vmatmul.f32.gmra.mxu2 %v504_v35  ;;  %v2634_v30 = vpop.permute.xlu2 %645  ;;  %v2636_v35 = vpop.permute.xlu0 %635 }
 0x11c   :  { %784 = vmatmul.f32.gmra.mxu1 %v507_v36  ;;  %894 = vmatmul.f32.gmra.mxu2 %v506_v20 }
 0x124   :  { %787 = vmatmul.f32.gmra.mxu1 %v509_v38  ;;  %897 = vmatmul.f32.gmra.mxu2 %v508_v53  ;;  %v547_v38 = vld [vmem:[%s3142_s3 + $0x190] sm:$0xff]  ;;  %v546_v53 = vld [vmem:[%s3142_s3 + $0x188] sm:$0xff] }
 0x12c   :  { %790 = vmatmul.f32.gmra.mxu1 %v511_v8  ;;  %900 = vmatmul.f32.gmra.mxu2 %v510_v41  ;;  %v2648_v8 = vpop.permute.xlu1 %750  ;;  %v2650_v41 = vpop.permute.xlu2 %740 }
 0x12d   :  { %3148 = vst [vmem:[#allocation6_spill] sm:$0xff] %v2648_v8 }
 0x12e   :  { %3149 = vst [vmem:[#allocation7_spill] sm:$0xff] %v2650_v41 }
 0x134   :  { %793 = vmatmul.f32.gmra.mxu1 %v513_v10  ;;  %903 = vmatmul.f32.gmra.mxu2 %v512_v42  ;;  %v2654_v42 = vpop.permute.xlu0 %730 }
 0x135   :  { %3150 = vst [vmem:[#allocation8_spill] sm:$0xff] %v2654_v42 }
 0x13c   :  { %796 = vmatmul.f32.gmra.mxu1 %v515_v47  ;;  %906 = vmatmul.f32.gmra.mxu2 %v514_v61  ;;  %v549_v61 = vld [vmem:[%s3142_s3 + $0x1a0] sm:$0xff] }
 0x144   :  { %799 = vmatmul.f32.gmra.mxu1 %v517_v11  ;;  %909 = vmatmul.f32.gmra.mxu2 %v516_v48  ;;  %v548_v11 = vld [vmem:[%s3142_s3 + $0x198] sm:$0xff]  ;;  %v2664_v48 = vpop.permute.xlu1 %640 }
 0x14c   :  { %802 = vmatmul.f32.gmra.mxu1 %v519_v63  ;;  %912 = vmatmul.f32.gmra.mxu2 %v518_v4  ;;  %v2668_v4 = vpop.permute.xlu2 %630 }
 0x154   :  { %805 = vmatmul.f32.gmra.mxu1 %v521_v51  ;;  %915 = vmatmul.f32.gmra.mxu2 %v520_v49  ;;  %v551_v49 = vld [vmem:[%s3142_s3 + $0x1b0] sm:$0xff] }
 0x15c   :  { %808 = vmatmul.f32.gmra.mxu1 %v523_v40  ;;  %918 = vmatmul.f32.gmra.mxu2 %v522_v13  ;;  %v550_v40 = vld [vmem:[%s3142_s3 + $0x1a8] sm:$0xff]  ;;  %v2676_v13 = vpop.permute.xlu0 %620 }
 0x164   :  { %811 = vmatmul.f32.gmra.mxu1 %v525_v50  ;;  %921 = vmatmul.f32.gmra.mxu2 %v524_v52  ;;  %v2680_v52 = vpop.permute.xlu1 %735 }
 0x165   :  { %3151 = vst [vmem:[#allocation9_spill] sm:$0xff] %v2680_v52 }
 0x16c   :  { %814 = vmatmul.f32.gmra.mxu1 %v527_v54  ;;  %924 = vmatmul.f32.gmra.mxu2 %v526_v55  ;;  %v553_v55 = vld [vmem:[%s3142_s3 + $0x1c0] sm:$0xff] }
 0x171   :  { %v2536_v31 = vpop.f32.mrf.mxu1 }
 0x174   :  { %817 = vmatmul.f32.gmra.mxu1 %v529_v37  ;;  %927 = vmatmul.f32.gmra.mxu2 %v528_v43  ;;  %v552_v37 = vld [vmem:[%s3142_s3 + $0x1b8] sm:$0xff]  ;;  %v2688_v43 = vpop.permute.xlu2 %725 }
 0x175   :  { %3152 = vst [vmem:[#allocation10_spill] sm:$0xff] %v2688_v43 }
 0x179   :  { %v2544_v56 = vpop.f32.mrf.mxu1 }
 0x17c   :  { %820 = vmatmul.f32.gmra.mxu1 %v531_v58  ;;  %930 = vmatmul.f32.gmra.mxu2 %v530_v32  ;;  %v2690_v58 = vpop.permute.xlu0 %715 }
 0x17f   :  { %v2552_v60 = vpop.f32.mrf.mxu2 }
 0x181   :  { %v2554_v34 = vpop.f32.mrf.mxu1 }
 0x184   :  { %823 = vmatmul.f32.gmra.mxu1 %v533_v62  ;;  %933 = vmatmul.f32.gmra.mxu2 %v532_v46  ;;  %v555_v46 = vld [vmem:[%s3142_s3 + $0x1d0] sm:$0xff] }
 0x187   :  { %v2562_v23 = vpop.f32.mrf.mxu2 }
 0x189   :  { %v2564_v0 = vpop.f32.mrf.mxu1 }
 0x18c   :  { %826 = vmatmul.f32.gmra.mxu1 %v535_v1  ;;  %936 = vmatmul.f32.gmra.mxu2 %v534_v57  ;;  %v554_v1 = vld [vmem:[%s3142_s3 + $0x1c8] sm:$0xff]  ;;  %v2698_v57 = vpop.permute.xlu1 %625 }
 0x18f   :  { %v2572_v3 = vpop.f32.mrf.mxu2 }
 0x191   :  { %v2574_v5 = vpop.f32.mrf.mxu1 }
 0x194   :  { %829 = vmatmul.f32.gmra.mxu1 %v537_v6  ;;  %939 = vmatmul.f32.gmra.mxu2 %v536_v7  ;;  %v2700_v6 = vpop.permute.xlu2 %615  ;;  %v2702_v7 = vpop.permute.xlu0 %605 }
 0x197   :  { %v2582_v9 = vpop.f32.mrf.mxu2 }
 0x199   :  { %v2586_v15 = vpop.f32.mrf.mxu1 }
 0x19c   :  { %832 = vmatmul.f32.gmra.mxu1 %v539_v45  ;;  %942 = vmatmul.f32.gmra.mxu2 %v538_v59 }
 0x19f   :  { %v2594_v17 = vpop.f32.mrf.mxu2 }
 0x1a1   :  { %v2598_v12 = vpop.f32.mrf.mxu1 }
 0x1a4   :  { %835 = vmatmul.f32.gmra.mxu1 %v541_v22  ;;  %945 = vmatmul.f32.gmra.mxu2 %v540_v26  ;;  %v557_v22 = vld [vmem:[%s3142_s3 + $0x1e0] sm:$0xff]  ;;  %v556_v26 = vld [vmem:[%s3142_s3 + $0x1d8] sm:$0xff] }
 0x1a7   :  { %v2608_v33 = vpop.f32.mrf.mxu2 }
 0x1a9   :  { %v2610_v2 = vpop.f32.mrf.mxu1 }
 0x1ac   :  { %838 = vmatmul.f32.gmra.mxu1 %v543_v21  ;;  %948 = vmatmul.f32.gmra.mxu2 %v542_v39  ;;  %v2710_v21 = vpop.permute.xlu1 %720  ;;  %v2712_v39 = vpop.permute.xlu2 %710 }
 0x1ad   :  { %3153 = vst [vmem:[#allocation11_spill] sm:$0xff] %v2710_v21 }
 0x1af   :  { %v2622_v44 = vpop.f32.mrf.mxu2 }
 0x1b1   :  { %v2624_v16 = vpop.f32.mrf.mxu1 }
 0x1b4   :  { %841 = vmatmul.f32.gmra.mxu1 %v545_v27  ;;  %951 = vmatmul.f32.gmra.mxu2 %v544_v28  ;;  %v2714_v28 = vpop.permute.xlu0 %700 }
 0x1b7   :  { %v2638_v36 = vpop.f32.mrf.mxu2 }
 0x1b9   :  { %v2640_v20 = vpop.f32.mrf.mxu1 }
 0x1bc   :  { %844 = vmatmul.f32.gmra.mxu1 %v547_v38  ;;  %954 = vmatmul.f32.gmra.mxu2 %v546_v53  ;;  %v559_v53 = vld [vmem:[%s3142_s3 + $0x1f0] sm:$0xff] }
 0x1bf   :  { %v2652_v10 = vpop.f32.mrf.mxu2 }
 0x1c1   :  { %v2656_v47 = vpop.f32.mrf.mxu1 }
 0x1c4   :  { %847 = vmatmul.f32.gmra.mxu1 %v549_v61  ;;  %957 = vmatmul.f32.gmra.mxu2 %v548_v11  ;;  %v558_v61 = vld [vmem:[%s3142_s3 + $0x1e8] sm:$0xff]  ;;  %v2722_v11 = vpop.permute.xlu1 %610 }
 0x1c7   :  { %v2666_v63 = vpop.f32.mrf.mxu2 }
 0x1c9   :  { %v803_v51 = vpop.f32.mrf.mxu1 }
 0x1cc   :  { %850 = vmatmul.f32.gmra.mxu1 %v551_v49  ;;  %960 = vmatmul.f32.gmra.mxu2 %v550_v40  ;;  %v2724_v40 = vpop.permute.xlu2 %600  ;;  %v2734_v43 = vpop.permute.xlu1 %705 }
 0x1cf   :  { %v2678_v50 = vpop.f32.mrf.mxu2 }
 0x1d1   :  { %v806_v54 = vpop.f32.mrf.mxu1 }
 0x1d2   :  { %v807_v52 = vadd.f32 %v806_v54, %v2618_v19  ;;  %v798_v19 = vadd.f32 %v2640_v20, %v2664_v48  ;;  %v792_v20 = vadd.f32 %v2610_v2, %v2668_v4 }
 0x1d4   :  { %853 = vmatmul.f32.gmra.mxu1 %v553_v55  ;;  %963 = vmatmul.f32.gmra.mxu2 %v552_v37  ;;  %v560_v37 = vld [vmem:[%s3142_s3 + $0x1f8] sm:$0xff]  ;;  %v2737_v8 = vpop.permute.xlu2 %695 }
 0x1d7   :  { %v916_v32 = vpop.f32.mrf.mxu2 }
 0x1d9   :  { %v809_v62 = vpop.f32.mrf.mxu1 }
 0x1dc   :  { %856 = vmatmul.f32.gmra.mxu1 %v555_v46  ;;  %966 = vmatmul.f32.gmra.mxu2 %v554_v1  ;;  %v2729_v46 = vpop.permute.xlu0 %690 }
 0x1df   :  { %v919_v45 = vpop.f32.mrf.mxu2 }
 0x1e0   :  { %v920_v24 = vadd.f32 %v919_v45, %v807_v52  ;;  %v795_v52 = vadd.f32 %v2624_v16, %v2636_v35  ;;  %v905_v16 = vadd.f32 %v2638_v36, %v792_v20 }
 0x1e1   :  { %v812_v59 = vpop.f32.mrf.mxu1 }
 0x1e2   :  { %v813_v1 = vadd.f32 %v812_v59, %v2584_v14  ;;  %v908_v48 = vadd.f32 %v2652_v10, %v795_v52 }
 0x1e4   :  { %859 = vmatmul.f32.gmra.mxu1 %v557_v22  ;;  %969 = vmatmul.f32.gmra.mxu2 %v556_v26  ;;  %v676_v14 = vpop.permute.xlu0 %675 }
 0x1e7   :  { %v922_v27 = vpop.f32.mrf.mxu2 }
 0x1e9   :  { %v815_v38 = vpop.f32.mrf.mxu1 }
 0x1ea   :  { %v816_v22 = vadd.f32 %v815_v38, %v2596_v25  ;;  %v801_v25 = vadd.f32 %v2656_v47, %v2634_v30  ;;  %v911_v30 = vadd.f32 %v2666_v63, %v798_v19 }
 0x1ec   :  { %862 = vmatmul.f32.gmra.mxu1 %v559_v53  ;;  %972 = vmatmul.f32.gmra.mxu2 %v558_v61  ;;  %v810_v53 = vadd.f32 %v809_v62, %v2632_v29  ;;  %v914_v54 = vadd.f32 %v2678_v50, %v801_v25 }
 0x1ee   :  { %v923_v41 = vadd.f32 %v922_v27, %v810_v53  ;;  %v786_v27 = vadd.f32 %v2586_v15, %v2676_v13 }
 0x1ef   :  { %v925_v49 = vpop.f32.mrf.mxu2 }
 0x1f0   :  { %v926_v61 = vadd.f32 %v925_v49, %v813_v1  ;;  %v899_v36 = vadd.f32 %v2608_v33, %v786_v27 }
 0x1f1   :  { %v818_v55 = vpop.f32.mrf.mxu1 }
 0x1f2   :  { %v819_v62 = vadd.f32 %v818_v55, %v676_v14  ;;  %v777_v55 = vadd.f32 %v2554_v34, %v2702_v7 }
 0x1f4   :  { %975 = vmatmul.f32.gmra.mxu2 %v560_v37  ;;  %v804_v37 = vadd.f32 %v803_v51, %v2606_v18 }
 0x1f6   :  { %v917_v29 = vadd.f32 %v916_v32, %v804_v37  ;;  %v789_v32 = vadd.f32 %v2598_v12, %v2698_v57  ;;  %v783_v12 = vadd.f32 %v2574_v5, %v2700_v6  ;;  %v780_v57 = vadd.f32 %v2564_v0, %v2722_v11 }
 0x1f7   :  { %v928_v26 = vpop.f32.mrf.mxu2  ;;  %v890_v0 = vadd.f32 %v2572_v3, %v777_v55  ;;  %v1031_v55 = vld [vmem:[%s3144_s5 + $0xa0] sm:$0xff] }
 0x1f8   :  { %v929_v21 = vadd.f32 %v928_v26, %v816_v22  ;;  %v902_v2 = vadd.f32 %v2622_v44, %v789_v32  ;;  %v896_v15 = vadd.f32 %v2594_v17, %v783_v12  ;;  %v893_v1 = vadd.f32 %v2582_v9, %v780_v57 }
 0x1f9   :  { %v821_v42 = vpop.f32.mrf.mxu1  ;;  %v774_v22 = vadd.f32 %v2544_v56, %v2724_v40 }
 0x1fa   :  { %1721 = vtanh.f32 %v929_v21 }
 0x1fb   :  { %1723 = vtanh.f32 %v926_v61  ;;  %v887_v9 = vadd.f32 %v2562_v23, %v774_v22 }
 0x1fc   :  { %1725 = vtanh.f32 %v923_v41  ;;  %v596_v41 = vpop.permute.xlu1 %595 }
 0x1fd   :  { %1727 = vtanh.f32 %v920_v24  ;;  %v681_v24 = vpop.permute.xlu2 %680  ;;  %v771_v34 = vadd.f32 %v2536_v31, %v596_v41 }
 0x1fe   :  { %1729 = vtanh.f32 %v917_v29  ;;  %v822_v35 = vadd.f32 %v821_v42, %v681_v24 }
 0x1ff   :  { %v931_v59 = vpop.f32.mrf.mxu2  ;;  %1731 = vtanh.f32 %v914_v54  ;;  %v884_v53 = vadd.f32 %v2552_v60, %v771_v34  ;;  %v1011_v60 = vld [vmem:[%s3144_s5] sm:$0xff]  ;;  %v3156_v34 = vld [vmem:[#allocation7_spill] sm:$0xff] }
 0x200   :  { %v1722_v38 = vpop.eup %1721  ;;  %v2745_v21 = vadd.f32 %v931_v59, %v819_v62  ;;  %1733 = vtanh.f32 %v911_v30 }
 0x201   :  { %v824_v18 = vpop.f32.mrf.mxu1  ;;  %1267 = vmatpush.msrb.mxu3 %v1722_v38  ;;  %v1724_v51 = vpop.eup %1723  ;;  %1735 = vtanh.f32 %v908_v48  ;;  %v1013_v38 = vld [vmem:[%s3144_s5 + $0x10] sm:$0xff] }
 0x202   :  { %v1726_v47 = vpop.eup %1725  ;;  %1737 = vtanh.f32 %v905_v16 }
 0x203   :  { %1268 = vmatpush.msrb.mxu3 %v1724_v51  ;;  %v1728_v50 = vpop.eup %1727  ;;  %1739 = vtanh.f32 %v902_v2  ;;  %v1023_v2 = vld [vmem:[%s3144_s5 + $0x60] sm:$0xff] }
 0x204   :  { %v1730_v45 = vpop.eup %1729  ;;  %v686_v44 = vpop.permute.xlu1 %685  ;;  %1741 = vtanh.f32 %v899_v36  ;;  %v1027_v36 = vld [vmem:[%s3144_s5 + $0x80] sm:$0xff] }
 0x205   :  { %1269 = vmatpush.msrb.mxu3 %v1726_v47  ;;  %v1732_v49 = vpop.eup %1731  ;;  %v825_v5 = vadd.f32 %v824_v18, %v686_v44  ;;  %1743 = vtanh.f32 %v896_v15  ;;  %v1029_v15 = vld [vmem:[%s3144_s5 + $0x90] sm:$0xff] }
 0x206   :  { %v1734_v42 = vpop.eup %1733  ;;  %1745 = vtanh.f32 %v893_v1 }
 0x207   :  { %v934_v63 = vpop.f32.mrf.mxu2  ;;  %1270 = vmatpush.msrb.mxu3 %v1728_v50  ;;  %v1736_v13 = vpop.eup %1735  ;;  %1747 = vtanh.f32 %v890_v0  ;;  %v3155_v0 = vld [vmem:[#allocation6_spill] sm:$0xff] }
 0x208   :  { %v2759_v10 = vadd.f32 %v934_v63, %v822_v35  ;;  %v1738_v6 = vpop.eup %1737  ;;  %1749 = vtanh.f32 %v887_v9 }
 0x209   :  { %v827_v4 = vpop.f32.mrf.mxu1  ;;  %1271 = vmatpush.msrb.mxu3 %v1730_v45  ;;  %v1740_v26 = vpop.eup %1739  ;;  %1751 = vtanh.f32 %v884_v53  ;;  %v1021_v45 = vld [vmem:[%s3144_s5 + $0x50] sm:$0xff] }
 0x20a   :  { %v1742_v7 = vpop.eup %1741  ;;  %v828_v3 = vadd.f32 %v827_v4, %v2729_v46 }
 0x20b   :  { %1272 = vmatpush.msrb.mxu3 %v1732_v49  ;;  %v1744_v56 = vpop.eup %1743 }
 0x20c   :  { %v1746_v61 = vpop.eup %1745 }
 0x20d   :  { %1273 = vmatpush.msrb.mxu3 %v1734_v42  ;;  %v1748_v23 = vpop.eup %1747 }
 0x20e   :  { %v1750_v14 = vpop.eup %1749 }
 0x20f   :  { %v937_v33 = vpop.f32.mrf.mxu2  ;;  %1274 = vmatpush.msrb.mxu3 %v1736_v13  ;;  %v1752_v25 = vpop.eup %1751 }
 0x210   :  { %v2773_v17 = vadd.f32 %v937_v33, %v825_v5  ;;  %v1033_v33 = vld [vmem:[%s3144_s5 + $0xb0] sm:$0xff] }
 0x211   :  { %v830_v11 = vpop.f32.mrf.mxu1  ;;  %1275 = vmatpush.msrb.mxu3 %v1738_v6  ;;  %v3154_v6 = vld [vmem:[#allocation5_spill] sm:$0xff] }
 0x212   :  { %v831_v29 = vadd.f32 %v830_v11, %v2737_v8  ;;  %v1015_v8 = vld [vmem:[%s3144_s5 + $0x20] sm:$0xff] }
 0x213   :  { %1276 = vmatpush.msrb.mxu3 %v1740_v26 }
 0x215   :  { %1277 = vmatpush.msrb.mxu3 %v1742_v7 }
 0x217   :  { %v940_v40 = vpop.f32.mrf.mxu2  ;;  %1278 = vmatpush.msrb.mxu3 %v1744_v56  ;;  %v3157_v56 = vld [vmem:[#allocation9_spill] sm:$0xff] }
 0x218   :  { %v2779_v37 = vadd.f32 %v940_v40, %v828_v3 }
 0x219   :  { %v833_v31 = vpop.f32.mrf.mxu1  ;;  %1279 = vmatpush.msrb.mxu3 %v1746_v61  ;;  %v3158_v61 = vld [vmem:[#allocation8_spill] sm:$0xff] }
 0x21a   :  { %v834_v19 = vadd.f32 %v833_v31, %v2714_v28  ;;  %v1017_v28 = vld [vmem:[%s3144_s5 + $0x30] sm:$0xff] }
 0x21b   :  { %1280 = vmatpush.msrb.mxu3 %v1748_v23 }
 0x21d   :  { %1281 = vmatpush.msrb.mxu3 %v1750_v14  ;;  %v1035_v14 = vld [vmem:[%s3144_s5 + $0xc0] sm:$0xff] }
 0x21f   :  { %v943_v46 = vpop.f32.mrf.mxu2  ;;  %1282 = vmatpush.msrb.mxu3 %v1752_v25 }
 0x220   :  { %v2785_v62 = vadd.f32 %v943_v46, %v831_v29  ;;  %1283 = vmatmul.f32.vlgmr.msrb.gmra.mxu3 %v1011_v60  ;;  %v3159_v60 = vld [vmem:[#allocation10_spill] sm:$0xff] }
 0x221   :  { %v836_v59 = vpop.f32.mrf.mxu1 }
 0x222   :  { %v837_v52 = vadd.f32 %v836_v59, %v2734_v43  ;;  %v1019_v43 = vld [vmem:[%s3144_s5 + $0x40] sm:$0xff]  ;;  %v3160_v59 = vld [vmem:[#allocation11_spill] sm:$0xff] }
 0x227   :  { %v946_v54 = vpop.f32.mrf.mxu2 }
 0x228   :  { %v2791_v18 = vadd.f32 %v946_v54, %v834_v19  ;;  %1286 = vmatmul.f32.gmra.mxu3 %v1013_v38 }
 0x229   :  { %v839_v51 = vpop.f32.mrf.mxu1 }
 0x22a   :  { %v840_v20 = vadd.f32 %v839_v51, %v2712_v39 }
 0x22f   :  { %v949_v30 = vpop.f32.mrf.mxu2 }
 0x230   :  { %v2797_v41 = vadd.f32 %v949_v30, %v837_v52  ;;  %1289 = vmatmul.f32.gmra.mxu3 %v1015_v8  ;;  %v1037_v52 = vld [vmem:[%s3144_s5 + $0xd0] sm:$0xff] }
 0x231   :  { %v842_v47 = vpop.f32.mrf.mxu1 }
 0x232   :  { %v843_v32 = vadd.f32 %v842_v47, %v2690_v58  ;;  %v1025_v58 = vld [vmem:[%s3144_s5 + $0x70] sm:$0xff] }
 0x237   :  { %v952_v48 = vpop.f32.mrf.mxu2 }
 0x238   :  { %v2803_v24 = vadd.f32 %v952_v48, %v840_v20  ;;  %1292 = vmatmul.f32.gmra.mxu3 %v1017_v28  ;;  %v1039_v48 = vld [vmem:[%s3144_s5 + $0xe0] sm:$0xff] }
 0x239   :  { %v845_v50 = vpop.f32.mrf.mxu1 }
 0x23a   :  { %v846_v38 = vadd.f32 %v845_v50, %v3160_v59 }
 0x23f   :  { %v955_v16 = vpop.f32.mrf.mxu2 }
 0x240   :  { %v956_v35 = vadd.f32 %v955_v16, %v843_v32  ;;  %1295 = vmatmul.f32.gmra.mxu3 %v1019_v43 }
 0x241   :  { %v848_v63 = vpop.f32.mrf.mxu1 }
 0x242   :  { %v849_v25 = vadd.f32 %v848_v63, %v3159_v60  ;;  %v1042_v60 = vld [vmem:[%s3144_s5 + $0xf8] sm:$0xff] }
 0x247   :  { %v958_v39 = vpop.f32.mrf.mxu2 }
 0x248   :  { %1298 = vmatmul.f32.gmra.mxu3 %v1021_v45  ;;  %v959_v51 = vadd.f32 %v958_v39, %v846_v38  ;;  %v1047_v45 = vld [vmem:[%s3144_s5 + $0x120] sm:$0xff]  ;;  %v1016_v39 = vld [vmem:[%s3144_s5 + $0x28] sm:$0xff]  ;;  %v1046_v38 = vld [vmem:[%s3144_s5 + $0x118] sm:$0xff] }
 0x249   :  { %v851_v27 = vpop.f32.mrf.mxu1 }
 0x24a   :  { %v852_v31 = vadd.f32 %v851_v27, %v3158_v61  ;;  %v1049_v27 = vld [vmem:[%s3144_s5 + $0x130] sm:$0xff]  ;;  %v1071_v61 = vld [vmem:[%s3144_s5 + $0x1e0] sm:$0xff] }
 0x24f   :  { %v961_v4 = vpop.f32.mrf.mxu2 }
 0x250   :  { %1301 = vmatmul.f32.gmra.mxu3 %v1023_v2  ;;  %v962_v19 = vadd.f32 %v961_v4, %v849_v25  ;;  %v1018_v2 = vld [vmem:[%s3144_s5 + $0x38] sm:$0xff]  ;;  %v1051_v4 = vld [vmem:[%s3144_s5 + $0x140] sm:$0xff] }
 0x251   :  { %v854_v49 = vpop.f32.mrf.mxu1 }
 0x252   :  { %v855_v3 = vadd.f32 %v854_v49, %v3157_v56  ;;  %v1020_v49 = vld [vmem:[%s3144_s5 + $0x48] sm:$0xff] }
 0x257   :  { %v964_v12 = vpop.f32.mrf.mxu2 }
 0x258   :  { %1304 = vmatmul.f32.gmra.mxu3 %v1025_v58  ;;  %v965_v29 = vadd.f32 %v964_v12, %v852_v31  ;;  %v1053_v58 = vld [vmem:[%s3144_s5 + $0x150] sm:$0xff]  ;;  %v1022_v12 = vld [vmem:[%s3144_s5 + $0x58] sm:$0xff]  ;;  %v1040_v31 = vld [vmem:[%s3144_s5 + $0xe8] sm:$0xff] }
 0x259   :  { %v857_v42 = vpop.f32.mrf.mxu1 }
 0x25a   :  { %v858_v9 = vadd.f32 %v857_v42, %v3156_v34  ;;  %v1024_v42 = vld [vmem:[%s3144_s5 + $0x68] sm:$0xff]  ;;  %v1034_v34 = vld [vmem:[%s3144_s5 + $0xb8] sm:$0xff] }
 0x25f   :  { %v967_v57 = vpop.f32.mrf.mxu2 }
 0x260   :  { %1307 = vmatmul.f32.gmra.mxu3 %v1027_v36  ;;  %v968_v23 = vadd.f32 %v967_v57, %v855_v3  ;;  %v1055_v36 = vld [vmem:[%s3144_s5 + $0x160] sm:$0xff]  ;;  %v1069_v3 = vld [vmem:[%s3144_s5 + $0x1d0] sm:$0xff] }
 0x261   :  { %v860_v13 = vpop.f32.mrf.mxu1 }
 0x262   :  { %v861_v22 = vadd.f32 %v860_v13, %v3154_v6 }
 0x267   :  { %v970_v44 = vpop.f32.mrf.mxu2 }
 0x268   :  { %1310 = vmatmul.f32.gmra.mxu3 %v1029_v15  ;;  %v971_v40 = vadd.f32 %v970_v44, %v858_v9  ;;  %v1057_v15 = vld [vmem:[%s3144_s5 + $0x170] sm:$0xff]  ;;  %v1026_v44 = vld [vmem:[%s3144_s5 + $0x78] sm:$0xff] }
 0x269   :  { %v863_v5 = vpop.f32.mrf.mxu1 }
 0x26a   :  { %v864_v11 = vadd.f32 %v863_v5, %v3155_v0  ;;  %v1061_v5 = vld [vmem:[%s3144_s5 + $0x190] sm:$0xff]  ;;  %v1032_v0 = vld [vmem:[%s3144_s5 + $0xa8] sm:$0xff] }
 0x26f   :  { %v973_v1 = vpop.f32.mrf.mxu2 }
 0x270   :  { %1313 = vmatmul.f32.gmra.mxu3 %v1031_v55  ;;  %v974_v7 = vadd.f32 %v973_v1, %v861_v22  ;;  %v1059_v55 = vld [vmem:[%s3144_s5 + $0x180] sm:$0xff]  ;;  %v1028_v1 = vld [vmem:[%s3144_s5 + $0x88] sm:$0xff] }
 0x271   :  { %v1063_v22 = vld [vmem:[%s3144_s5 + $0x1a0] sm:$0xff] }
 0x277   :  { %v976_v26 = vpop.f32.mrf.mxu2 }
 0x278   :  { %v977_v53 = vadd.f32 %v976_v26, %v864_v11  ;;  %1316 = vmatmul.f32.gmra.mxu3 %v1033_v33  ;;  %v1030_v33 = vld [vmem:[%s3144_s5 + $0x98] sm:$0xff]  ;;  %v1065_v26 = vld [vmem:[%s3144_s5 + $0x1b0] sm:$0xff] }
 0x27a   :  { %1753 = vtanh.f32 %v977_v53  ;;  %v1036_v53 = vld [vmem:[%s3144_s5 + $0xc8] sm:$0xff] }
 0x27b   :  { %1755 = vtanh.f32 %v974_v7  ;;  %v1067_v7 = vld [vmem:[%s3144_s5 + $0x1c0] sm:$0xff] }
 0x27c   :  { %1757 = vtanh.f32 %v971_v40  ;;  %v1038_v40 = vld [vmem:[%s3144_s5 + $0xd8] sm:$0xff] }
 0x27d   :  { %1759 = vtanh.f32 %v968_v23 }
 0x27e   :  { %1761 = vtanh.f32 %v965_v29 }
 0x27f   :  { %1763 = vtanh.f32 %v962_v19  ;;  %v2979_v19 = vpop.permute.xlu0 %1254 }
 0x280   :  { %v1754_v46 = vpop.eup %1753  ;;  %1319 = vmatmul.f32.gmra.mxu3 %v1035_v14  ;;  %1765 = vtanh.f32 %v959_v51  ;;  %v1073_v14 = vld [vmem:[%s3144_s5 + $0x1f0] sm:$0xff] }
 0x281   :  { %1380 = vmatpush.msrb.mxu0 %v1754_v46  ;;  %v1756_v54 = vpop.eup %1755  ;;  %1767 = vtanh.f32 %v956_v35  ;;  %v1012_v35 = vld [vmem:[%s3144_s5 + $0x8] sm:$0xff] }
 0x282   :  { %v1758_v8 = vpop.eup %1757  ;;  %1769 = vtanh.f32 %v2803_v24  ;;  %v1044_v46 = vld [vmem:[%s3144_s5 + $0x108] sm:$0xff] }
 0x283   :  { %1381 = vmatpush.msrb.mxu0 %v1756_v54  ;;  %v1760_v30 = vpop.eup %1759  ;;  %1771 = vtanh.f32 %v2797_v41  ;;  %v1041_v41 = vld [vmem:[%s3144_s5 + $0xf0] sm:$0xff] }
 0x284   :  { %v1762_v47 = vpop.eup %1761  ;;  %1773 = vtanh.f32 %v2791_v18 }
 0x285   :  { %1382 = vmatpush.msrb.mxu0 %v1758_v8  ;;  %v1764_v28 = vpop.eup %1763  ;;  %1775 = vtanh.f32 %v2785_v62  ;;  %v1048_v8 = vld [vmem:[%s3144_s5 + $0x128] sm:$0xff] }
 0x286   :  { %v1766_v20 = vpop.eup %1765  ;;  %1777 = vtanh.f32 %v2779_v37 }
 0x287   :  { %1383 = vmatpush.msrb.mxu0 %v1760_v30  ;;  %v1768_v50 = vpop.eup %1767  ;;  %1779 = vtanh.f32 %v2773_v17  ;;  %v1043_v17 = vld [vmem:[%s3144_s5 + $0x100] sm:$0xff] }
 0x288   :  { %1322 = vmatmul.f32.gmra.mxu3 %v1037_v52  ;;  %v1770_v43 = vpop.eup %1769  ;;  %1781 = vtanh.f32 %v2759_v10  ;;  %v1014_v10 = vld [vmem:[%s3144_s5 + $0x18] sm:$0xff]  ;;  %v2986_v52 = vpop.permute.xlu0 %1179 }
 0x289   :  { %1384 = vmatpush.msrb.mxu0 %v1762_v47  ;;  %v1772_v32 = vpop.eup %1771  ;;  %1783 = vtanh.f32 %v2745_v21  ;;  %v1045_v21 = vld [vmem:[%s3144_s5 + $0x110] sm:$0xff] }
 0x28a   :  { %v1774_v24 = vpop.eup %1773 }
 0x28b   :  { %1385 = vmatpush.msrb.mxu0 %v1764_v28  ;;  %v1776_v16 = vpop.eup %1775  ;;  %v1050_v28 = vld [vmem:[%s3144_s5 + $0x138] sm:$0xff] }
 0x28c   :  { %v1778_v18 = vpop.eup %1777 }
 0x28d   :  { %1386 = vmatpush.msrb.mxu0 %v1766_v20  ;;  %v1780_v62 = vpop.eup %1779 }
 0x28e   :  { %v1782_v37 = vpop.eup %1781 }
 0x28f   :  { %1387 = vmatpush.msrb.mxu0 %v1768_v50  ;;  %v1784_v63 = vpop.eup %1783  ;;  %v1052_v50 = vld [vmem:[%s3144_s5 + $0x148] sm:$0xff] }
 0x290   :  { %1325 = vmatmul.f32.gmra.mxu3 %v1039_v48  ;;  %v2995_v20 = vpop.permute.xlu0 %1239 }
 0x291   :  { %1388 = vmatpush.msrb.mxu0 %v1770_v43  ;;  %3161 = vst [vmem:[#allocation5_spill] sm:$0xff] %v2995_v20 }
 0x293   :  { %1389 = vmatpush.msrb.mxu0 %v1772_v32  ;;  %v3004_v32 = vpop.permute.xlu2 %1259 }
 0x295   :  { %1390 = vmatpush.msrb.mxu0 %v1774_v24 }
 0x297   :  { %1391 = vmatpush.msrb.mxu0 %v1776_v16  ;;  %v3011_v16 = vpop.permute.xlu1 %1264 }
 0x298   :  { %1328 = vmatmul.f32.gmra.mxu3 %v1041_v41  ;;  %v1054_v41 = vld [vmem:[%s3144_s5 + $0x158] sm:$0xff]  ;;  %3162 = vst [vmem:[#allocation6_spill] sm:$0xff] %v3011_v16 }
 0x299   :  { %1392 = vmatpush.msrb.mxu0 %v1778_v18  ;;  %v3013_v18 = vpop.permute.xlu0 %1164 }
 0x29b   :  { %1393 = vmatpush.msrb.mxu0 %v1780_v62 }
 0x29d   :  { %1394 = vmatpush.msrb.mxu0 %v1782_v37  ;;  %v3017_v37 = vpop.permute.xlu2 %1249 }
 0x29e   :  { %3163 = vst [vmem:[#allocation7_spill] sm:$0xff] %v3017_v37 }
 0x29f   :  { %1395 = vmatpush.msrb.mxu0 %v1784_v63  ;;  %v1185_v63 = vpop.permute.xlu1 %1184 }
 0x2a0   :  { %1331 = vmatmul.f32.gmra.mxu3 %v1043_v17  ;;  %1396 = vmatmul.f32.vlgmr.msrb.gmra.mxu0 %v1012_v35  ;;  %v1056_v35 = vld [vmem:[%s3144_s5 + $0x168] sm:$0xff] }
 0x2a3   :  { %v2899_v57 = vpop.f32.mrf.mxu3 }
 0x2a8   :  { %1334 = vmatmul.f32.gmra.mxu3 %v1045_v21  ;;  %1399 = vmatmul.f32.gmra.mxu0 %v1014_v10  ;;  %v3024_v21 = vpop.permute.xlu0 %1224 }
 0x2ab   :  { %v2907_v13 = vpop.f32.mrf.mxu3 }
 0x2b0   :  { %1337 = vmatmul.f32.gmra.mxu3 %v1047_v45  ;;  %1402 = vmatmul.f32.gmra.mxu0 %v1016_v39  ;;  %v1175_v45 = vpop.permute.xlu2 %1174 }
 0x2b3   :  { %v2921_v6 = vpop.f32.mrf.mxu3 }
 0x2b8   :  { %1340 = vmatmul.f32.gmra.mxu3 %v1049_v27  ;;  %1405 = vmatmul.f32.gmra.mxu0 %v1018_v2  ;;  %v1058_v27 = vld [vmem:[%s3144_s5 + $0x178] sm:$0xff]  ;;  %v3031_v2 = vpop.permute.xlu1 %1244 }
 0x2b9   :  { %3164 = vst [vmem:[#allocation9_spill] sm:$0xff] %v3031_v2 }
 0x2bb   :  { %v2929_v11 = vpop.f32.mrf.mxu3 }
 0x2c0   :  { %1343 = vmatmul.f32.gmra.mxu3 %v1051_v4  ;;  %1408 = vmatmul.f32.gmra.mxu0 %v1020_v49  ;;  %v1150_v4 = vpop.permute.xlu0 %1149 }
 0x2c3   :  { %v2937_v9 = vpop.f32.mrf.mxu3 }
 0x2c8   :  { %1346 = vmatmul.f32.gmra.mxu3 %v1053_v58  ;;  %1411 = vmatmul.f32.gmra.mxu0 %v1022_v12 }
 0x2cb   :  { %v2945_v56 = vpop.f32.mrf.mxu3 }
 0x2d0   :  { %1349 = vmatmul.f32.gmra.mxu3 %v1055_v36  ;;  %1414 = vmatmul.f32.gmra.mxu0 %v1024_v42  ;;  %v1060_v36 = vld [vmem:[%s3144_s5 + $0x188] sm:$0xff] }
 0x2d3   :  { %v2959_v23 = vpop.f32.mrf.mxu3 }
 0x2d8   :  { %1352 = vmatmul.f32.gmra.mxu3 %v1057_v15  ;;  %1417 = vmatmul.f32.gmra.mxu0 %v1026_v44  ;;  %v3038_v15 = vpop.permute.xlu2 %1234  ;;  %v1170_v44 = vpop.permute.xlu1 %1169 }
 0x2d9   :  { %3165 = vst [vmem:[#allocation8_spill] sm:$0xff] %v3038_v15 }
 0x2db   :  { %v2967_v25 = vpop.f32.mrf.mxu3 }
 0x2e0   :  { %1355 = vmatmul.f32.gmra.mxu3 %v1059_v55  ;;  %1420 = vmatmul.f32.gmra.mxu0 %v1028_v1  ;;  %v1062_v1 = vld [vmem:[%s3144_s5 + $0x198] sm:$0xff] }
 0x2e3   :  { %v1308_v54 = vpop.f32.mrf.mxu3 }
 0x2e4   :  { %v1309_v49 = vadd.f32 %v1308_v54, %v1150_v4 }
 0x2e8   :  { %1358 = vmatmul.f32.gmra.mxu3 %v1061_v5  ;;  %1423 = vmatmul.f32.gmra.mxu0 %v1030_v33  ;;  %v1160_v33 = vpop.permute.xlu2 %1159 }
 0x2eb   :  { %v2988_v30 = vpop.f32.mrf.mxu3 }
 0x2f0   :  { %1361 = vmatmul.f32.gmra.mxu3 %v1063_v22  ;;  %1426 = vmatmul.f32.gmra.mxu0 %v1032_v0  ;;  %v1064_v0 = vld [vmem:[%s3144_s5 + $0x1a8] sm:$0xff] }
 0x2f3   :  { %v3002_v43 = vpop.f32.mrf.mxu3 }
 0x2f8   :  { %1364 = vmatmul.f32.gmra.mxu3 %v1065_v26  ;;  %1429 = vmatmul.f32.gmra.mxu0 %v1034_v34  ;;  %v3046_v26 = vpop.permute.xlu1 %1229 }
 0x2fb   :  { %v3015_v62 = vpop.f32.mrf.mxu3 }
 0x300   :  { %1367 = vmatmul.f32.gmra.mxu3 %v1067_v7  ;;  %1432 = vmatmul.f32.gmra.mxu0 %v1036_v53  ;;  %v3048_v7 = vpop.permute.xlu2 %1219 }
 0x303   :  { %v1320_v10 = vpop.f32.mrf.mxu3 }
 0x304   :  { %v1321_v15 = vadd.f32 %v1320_v10, %v1170_v44 }
 0x308   :  { %1370 = vmatmul.f32.gmra.mxu3 %v1069_v3  ;;  %1435 = vmatmul.f32.gmra.mxu0 %v1038_v40  ;;  %v1066_v3 = vld [vmem:[%s3144_s5 + $0x1b8] sm:$0xff]  ;;  %v1155_v40 = vpop.permute.xlu1 %1154 }
 0x309   :  { %v1312_v10 = vadd.f32 %v2988_v30, %v1155_v40 }
 0x30b   :  { %v1323_v58 = vpop.f32.mrf.mxu3 }
 0x310   :  { %1373 = vmatmul.f32.gmra.mxu3 %v1071_v61  ;;  %1438 = vmatmul.f32.gmra.mxu0 %v1040_v31  ;;  %v1145_v31 = vpop.permute.xlu2 %1144 }
 0x313   :  { %v1326_v5 = vpop.f32.mrf.mxu3 }
 0x318   :  { %1376 = vmatmul.f32.gmra.mxu3 %v1073_v14  ;;  %1441 = vmatmul.f32.gmra.mxu0 %v1042_v60  ;;  %v1068_v60 = vld [vmem:[%s3144_s5 + $0x1c8] sm:$0xff] }
 0x31b   :  { %v1329_v34 = vpop.f32.mrf.mxu3 }
 0x31d   :  { %v2969_v29 = vpop.f32.mrf.mxu0 }
 0x320   :  { %1444 = vmatmul.f32.gmra.mxu0 %v1044_v46  ;;  %v3056_v46 = vpop.permute.xlu1 %1214 }
 0x323   :  { %v1332_v61 = vpop.f32.mrf.mxu3 }
 0x325   :  { %v2974_v59 = vpop.f32.mrf.mxu0 }
 0x328   :  { %1447 = vmatmul.f32.gmra.mxu0 %v1046_v38 }
 0x32b   :  { %v1335_v38 = vpop.f32.mrf.mxu3 }
 0x32d   :  { %v2981_v51 = vpop.f32.mrf.mxu0 }
 0x330   :  { %1450 = vmatmul.f32.gmra.mxu0 %v1048_v8  ;;  %v1070_v8 = vld [vmem:[%s3144_s5 + $0x1d8] sm:$0xff] }
 0x333   :  { %v3068_v4 = vpop.f32.mrf.mxu3 }
 0x335   :  { %v2990_v47 = vpop.f32.mrf.mxu0 }
 0x338   :  { %1453 = vmatmul.f32.gmra.mxu0 %v1050_v28  ;;  %v3061_v28 = vpop.permute.xlu2 %1204 }
 0x33d   :  { %v2997_v48 = vpop.f32.mrf.mxu0 }
 0x340   :  { %1456 = vmatmul.f32.gmra.mxu0 %v1052_v50  ;;  %v3063_v50 = vpop.permute.xlu0 %1209 }
 0x345   :  { %v3006_v24 = vpop.f32.mrf.mxu0 }
 0x348   :  { %1459 = vmatmul.f32.gmra.mxu0 %v1054_v41  ;;  %v1140_v41 = vpop.permute.xlu1 %1139 }
 0x34d   :  { %v3019_v17 = vpop.f32.mrf.mxu0 }
 0x350   :  { %1462 = vmatmul.f32.gmra.mxu0 %v1056_v35  ;;  %v3074_v37 = vpop.permute.xlu1 %1199 }
 0x355   :  { %v3026_v39 = vpop.f32.mrf.mxu0 }
 0x358   :  { %1465 = vmatmul.f32.gmra.mxu0 %v1058_v27  ;;  %v1072_v27 = vld [vmem:[%s3144_s5 + $0x1e8] sm:$0xff] }
 0x35d   :  { %v1421_v12 = vpop.f32.mrf.mxu0 }
 0x35e   :  { %v3036_v42 = vadd.f32 %v1421_v12, %v1309_v49  ;;  %v1130_v49 = vpop.permute.xlu2 %1129  ;;  %v1327_v12 = vadd.f32 %v1326_v5, %v2986_v52  ;;  %v3078_v52 = vpop.f32.mrf.mxu3 }
 0x360   :  { %1468 = vmatmul.f32.gmra.mxu0 %v1060_v36 }
 0x365   :  { %v1424_v55 = vpop.f32.mrf.mxu0 }
 0x368   :  { %1471 = vmatmul.f32.gmra.mxu0 %v1062_v1  ;;  %v1324_v1 = vadd.f32 %v1323_v58, %v1175_v45  ;;  %v1190_v58 = vpop.permute.xlu2 %1189 }
 0x369   :  { %v1333_v44 = vadd.f32 %v1332_v61, %v1190_v58 }
 0x36d   :  { %v1427_v22 = vpop.f32.mrf.mxu0 }
 0x370   :  { %1474 = vmatmul.f32.gmra.mxu0 %v1064_v0  ;;  %v1330_v0 = vadd.f32 %v1329_v34, %v1185_v63  ;;  %v1315_v63 = vadd.f32 %v3002_v43, %v1160_v33  ;;  %v1306_v43 = vadd.f32 %v2967_v25, %v1145_v31 }
 0x372   :  { %v1428_v5 = vadd.f32 %v1427_v22, %v1315_v63  ;;  %v1303_v22 = vadd.f32 %v2959_v23, %v1140_v41  ;;  %v1297_v23 = vadd.f32 %v2937_v9, %v1130_v49  ;;  %v1110_v63 = vpop.permute.xlu2 %1109 }
 0x374   :  { %v1416_v25 = vadd.f32 %v3019_v17, %v1303_v22  ;;  %v1410_v17 = vadd.f32 %v2997_v48, %v1297_v23  ;;  %v1339_v48 = vadd.f32 %v3068_v4, %v3074_v37 }
 0x375   :  { %v1430_v53 = vpop.f32.mrf.mxu0 }
 0x378   :  { %1477 = vmatmul.f32.gmra.mxu0 %v1066_v3  ;;  %v1135_v3 = vpop.permute.xlu0 %1134 }
 0x379   :  { %v1300_v61 = vadd.f32 %v2945_v56, %v1135_v3 }
 0x37d   :  { %v1433_v14 = vpop.f32.mrf.mxu0 }
 0x37e   :  { %v1434_v16 = vadd.f32 %v1433_v14, %v1321_v15 }
 0x380   :  { %1480 = vmatmul.f32.gmra.mxu0 %v1068_v60 }
 0x385   :  { %v1436_v54 = vpop.f32.mrf.mxu0 }
 0x386   :  { %v1437_v20 = vadd.f32 %v1436_v54, %v1324_v1 }
 0x388   :  { %1483 = vmatmul.f32.gmra.mxu0 %v1070_v8  ;;  %v1074_v8 = vld [vmem:[%s3144_s5 + $0x1f8] sm:$0xff]  ;;  %s1877_s5 = smov [#allocation2]  }
 0x389   :  { %s1604_s28 = sshll.u32 %s1877_s5, 4  ;;  %s1605_s28 = int_to_ptr.vmem [resolvable:$true] %s1604_s28 }
 0x38d   :  { %v1439_v35 = vpop.f32.mrf.mxu0 }
 0x38e   :  { %v1440_v36 = vadd.f32 %v1439_v35, %v1327_v12  ;;  %v1425_v12 = vadd.f32 %v1424_v55, %v1312_v10 }
 0x390   :  { %1486 = vmatmul.f32.gmra.mxu0 %v1072_v27  ;;  %1785 = vtanh.f32 %v1440_v36  ;;  %v1318_v27 = vadd.f32 %v3015_v62, %v3013_v18  ;;  %v1195_v62 = vpop.permute.xlu0 %1194 }
 0x391   :  { %v1336_v14 = vadd.f32 %v1335_v38, %v1195_v62 }
 0x392   :  { %v1431_v45 = vadd.f32 %v1430_v53, %v1318_v27  ;;  %v3087_v53 = vpop.f32.mrf.mxu3 }
 0x395   :  { %v1442_v60 = vpop.f32.mrf.mxu0 }
 0x396   :  { %v1443_v2 = vadd.f32 %v1442_v60, %v1330_v0  ;;  %v1786_v34 = vpop.eup %1785 }
 0x397   :  { %v1539_v33 = vmul.f32 %v1786_v34, %v1786_v34 }
 0x398   :  { %1787 = vtanh.f32 %v1443_v2  ;;  %1489 = vmatmul.f32.gmra.mxu0 %v1074_v8 }
 0x399   :  { %1789 = vtanh.f32 %v1437_v20  ;;  %v1125_v20 = vpop.permute.xlu1 %1124 }
 0x39a   :  { %1791 = vtanh.f32 %v1434_v16  ;;  %v1419_v16 = vadd.f32 %v3026_v39, %v1306_v43  ;;  %v1413_v39 = vadd.f32 %v3006_v24, %v1300_v61  ;;  %v1294_v56 = vadd.f32 %v2929_v11, %v1125_v20  ;;  %v1347_v58 = vpop.f32.mrf.mxu3 }
 0x39b   :  { %1793 = vtanh.f32 %v1431_v45  ;;  %v1348_v61 = vadd.f32 %v1347_v58, %v3056_v46 }
 0x39c   :  { %1795 = vtanh.f32 %v1428_v5  ;;  %v1407_v9 = vadd.f32 %v2990_v47, %v1294_v56  ;;  %v1285_v47 = vadd.f32 %v2899_v57, %v1110_v63  ;;  %v1342_v57 = vadd.f32 %v3078_v52, %v3061_v28 }
 0x39d   :  { %v1445_v54 = vpop.f32.mrf.mxu0  ;;  %1797 = vtanh.f32 %v1425_v12 }
 0x39e   :  { %v1788_v35 = vpop.eup %1787  ;;  %v3082_v18 = vadd.f32 %v1445_v54, %v1333_v44  ;;  %1799 = vtanh.f32 %v3036_v42  ;;  %v1120_v42 = vpop.permute.xlu0 %1119 }
 0x39f   :  { %v1540_v2 = vmul.f32 %v1788_v35, %v1788_v35  ;;  %v1790_v15 = vpop.eup %1789  ;;  %1801 = vtanh.f32 %v1419_v16  ;;  %v1291_v8 = vadd.f32 %v2921_v6, %v1120_v42  ;;  %v1345_v16 = vadd.f32 %v3087_v53, %v3063_v50 }
 0x3a0   :  { %v1792_v30 = vpop.eup %1791  ;;  %v1538_v55 = vmul.f32 %v1790_v15, %v1790_v15  ;;  %1803 = vtanh.f32 %v1416_v25 }
 0x3a1   :  { %1557 = vmatpush.msra.mxu1 %v1540_v2  ;;  %v1794_v40 = vpop.eup %1793  ;;  %v1537_v31 = vmul.f32 %v1792_v30, %v1792_v30  ;;  %1805 = vtanh.f32 %v1413_v39  ;;  %v1115_v24 = vpop.permute.xlu1 %1114  ;;  %v1404_v11 = vadd.f32 %v2981_v51, %v1291_v8  ;;  %v1398_v51 = vadd.f32 %v2969_v29, %v1285_v47 }
 0x3a2   :  { %v1796_v1 = vpop.eup %1795  ;;  %v1536_v0 = vmul.f32 %v1794_v40, %v1794_v40  ;;  %v1288_v45 = vadd.f32 %v2907_v13, %v1115_v24  ;;  %1807 = vtanh.f32 %v1410_v17  ;;  %v1350_v43 = vpop.f32.mrf.mxu3 }
 0x3a3   :  { %1558 = vmatpush.msra.mxu1 %v1539_v33  ;;  %v1798_v60 = vpop.eup %1797  ;;  %v1535_v38 = vmul.f32 %v1796_v1, %v1796_v1  ;;  %1809 = vtanh.f32 %v1407_v9 }
 0x3a4   :  { %v1800_v3 = vpop.eup %1799  ;;  %v1534_v49 = vmul.f32 %v1798_v60, %v1798_v60  ;;  %v1401_v5 = vadd.f32 %v2974_v59, %v1288_v45  ;;  %1811 = vtanh.f32 %v1404_v11 }
 0x3a5   :  { %v1448_v36 = vpop.f32.mrf.mxu0  ;;  %1559 = vmatpush.msra.mxu1 %v1538_v55  ;;  %v1802_v27 = vpop.eup %1801  ;;  %v1533_v10 = vmul.f32 %v1800_v3, %v1800_v3 }
 0x3a6   :  { %v3094_v41 = vadd.f32 %v1448_v36, %v1336_v14  ;;  %v1804_v6 = vpop.eup %1803  ;;  %v1532_v13 = vmul.f32 %v1802_v27, %v1802_v27  ;;  %1813 = vtanh.f32 %v1401_v5  ;;  %v1351_v36 = vadd.f32 %v1350_v43, %v3048_v7 }
 0x3a7   :  { %1560 = vmatpush.msra.mxu1 %v1537_v31  ;;  %v1806_v54 = vpop.eup %1805  ;;  %v1531_v37 = vmul.f32 %v1804_v6, %v1804_v6  ;;  %1815 = vtanh.f32 %v1398_v51 }
 0x3a8   :  { %v1808_v4 = vpop.eup %1807  ;;  %v1530_v35 = vmul.f32 %v1806_v54, %v1806_v54 }
 0x3a9   :  { %1561 = vmatpush.msra.mxu1 %v1536_v0  ;;  %v1810_v12 = vpop.eup %1809  ;;  %v1529_v62 = vmul.f32 %v1808_v4, %v1808_v4 }
 0x3aa   :  { %v1812_v2 = vpop.eup %1811  ;;  %v1528_v29 = vmul.f32 %v1810_v12, %v1810_v12  ;;  %v1353_v40 = vpop.f32.mrf.mxu3 }
 0x3ab   :  { %1562 = vmatpush.msra.mxu1 %v1535_v38  ;;  %v1527_v33 = vmul.f32 %v1812_v2, %v1812_v2  ;;  %v1354_v39 = vadd.f32 %v1353_v40, %v3024_v21 }
 0x3ac   :  { %v1814_v20 = vpop.eup %1813 }
 0x3ad   :  { %v1451_v44 = vpop.f32.mrf.mxu0  ;;  %1563 = vmatpush.msra.mxu1 %v1534_v49  ;;  %v1816_v30 = vpop.eup %1815  ;;  %v1526_v22 = vmul.f32 %v1814_v20, %v1814_v20 }
 0x3ae   :  { %v3106_v34 = vadd.f32 %v1451_v44, %v1339_v48  ;;  %v1525_v28 = vmul.f32 %v1816_v30, %v1816_v30  ;;  %v3167_v44 = vld [vmem:[#allocation7_spill] sm:$0xff] }
 0x3af   :  { %1564 = vmatpush.msra.mxu1 %v1533_v10 }
 0x3b1   :  { %1565 = vmatpush.msra.mxu1 %v1532_v13  ;;  %v3168_v13 = vld [vmem:[#allocation9_spill] sm:$0xff] }
 0x3b2   :  { %v1356_v31 = vpop.f32.mrf.mxu3 }
 0x3b3   :  { %1566 = vmatpush.msra.mxu1 %v1531_v37  ;;  %v1357_v60 = vadd.f32 %v1356_v31, %v3046_v26  ;;  %v3166_v26 = vld [vmem:[#allocation6_spill] sm:$0xff]  ;;  %v3169_v37 = vld [vmem:[#allocation5_spill] sm:$0xff] }
 0x3b5   :  { %v1454_v59 = vpop.f32.mrf.mxu0  ;;  %1567 = vmatpush.msra.mxu1 %v1530_v35 }
 0x3b6   :  { %v3111_v15 = vadd.f32 %v1454_v59, %v1342_v57 }
 0x3b7   :  { %1568 = vmatpush.msra.mxu1 %v1529_v62 }
 0x3b9   :  { %1569 = vmatpush.msra.mxu1 %v1528_v29  ;;  %v1876_v29 = vmov 1.0  }
 0x3ba   :  { %v1359_v50 = vpop.f32.mrf.mxu3 }
 0x3bb   :  { %1570 = vmatpush.msra.mxu1 %v1527_v33 }
 0x3bd   :  { %v1457_v55 = vpop.f32.mrf.mxu0  ;;  %1571 = vmatpush.msra.mxu1 %v1526_v22 }
 0x3be   :  { %v3115_v52 = vadd.f32 %v1457_v55, %v1345_v16 }
 0x3bf   :  { %1572 = vmatpush.msra.mxu1 %v1525_v28 }
 0x3c0   :  { %1573 = vmatmul.f32.vlgmr.msra.gmra.mxu1 %v1876_v29 }
 0x3c2   :  { %v1362_v42 = vpop.f32.mrf.mxu3 }
 0x3c3   :  { %v1363_v4 = vadd.f32 %v1362_v42, %v3169_v37 }
 0x3c5   :  { %v1460_v14 = vpop.f32.mrf.mxu0 }
 0x3c6   :  { %v3118_v25 = vadd.f32 %v1460_v14, %v1348_v61 }
 0x3ca   :  { %v1365_v46 = vpop.f32.mrf.mxu3 }
 0x3cb   :  { %v1366_v54 = vadd.f32 %v1365_v46, %v3168_v13 }
 0x3cd   :  { %v1463_v1 = vpop.f32.mrf.mxu0 }
 0x3ce   :  { %v1464_v23 = vadd.f32 %v1463_v1, %v1351_v36 }
 0x3d2   :  { %v1368_v8 = vpop.f32.mrf.mxu3 }
 0x3d3   :  { %v1369_v6 = vadd.f32 %v1368_v8, %v3167_v44 }
 0x3d5   :  { %v1466_v53 = vpop.f32.mrf.mxu0 }
 0x3d6   :  { %v1467_v0 = vadd.f32 %v1466_v53, %v1354_v39 }
 0x3da   :  { %v1371_v24 = vpop.f32.mrf.mxu3 }
 0x3db   :  { %v1372_v48 = vadd.f32 %v1371_v24, %v2979_v19 }
 0x3dd   :  { %v1469_v56 = vpop.f32.mrf.mxu0 }
 0x3de   :  { %v1470_v17 = vadd.f32 %v1469_v56, %v1357_v60 }
 0x3e2   :  { %v1374_v27 = vpop.f32.mrf.mxu3 }
 0x3e3   :  { %v1375_v21 = vadd.f32 %v1374_v27, %v3004_v32  ;;  %v3170_v32 = vld [vmem:[#allocation8_spill] sm:$0xff] }
 0x3e4   :  { %v1360_v12 = vadd.f32 %v1359_v50, %v3170_v32 }
 0x3e5   :  { %v1472_v38 = vpop.f32.mrf.mxu0 }
 0x3e6   :  { %v1473_v62 = vadd.f32 %v1472_v38, %v1360_v12 }
 0x3ea   :  { %v1377_v45 = vpop.f32.mrf.mxu3 }
 0x3eb   :  { %v1378_v58 = vadd.f32 %v1377_v45, %v3166_v26 }
 0x3ed   :  { %v1475_v3 = vpop.f32.mrf.mxu0 }
 0x3ee   :  { %v1476_v57 = vadd.f32 %v1475_v3, %v1363_v4 }
 0x3f5   :  { %v1478_v9 = vpop.f32.mrf.mxu0 }
 0x3f6   :  { %v1479_v35 = vadd.f32 %v1478_v9, %v1366_v54 }
 0x3fd   :  { %v1481_v49 = vpop.f32.mrf.mxu0 }
 0x3fe   :  { %v1482_v51 = vadd.f32 %v1481_v49, %v1369_v6 }
 0x405   :  { %v1484_v7 = vpop.f32.mrf.mxu0 }
 0x406   :  { %v1485_v47 = vadd.f32 %v1484_v7, %v1372_v48 }
 0x40d   :  { %v1487_v63 = vpop.f32.mrf.mxu0 }
 0x40e   :  { %v1488_v11 = vadd.f32 %v1487_v63, %v1375_v21 }
 0x410   :  { %1817 = vtanh.f32 %v1488_v11 }
 0x415   :  { %v1490_v10 = vpop.f32.mrf.mxu0 }
 0x416   :  { %v1491_v5 = vadd.f32 %v1490_v10, %v1378_v58  ;;  %v1818_v19 = vpop.eup %1817 }
 0x417   :  { %v1555_v20 = vmul.f32 %v1818_v19, %v1818_v19 }
 0x418   :  { %1819 = vtanh.f32 %v1491_v5 }
 0x419   :  { %1821 = vtanh.f32 %v1485_v47 }
 0x41a   :  { %1823 = vtanh.f32 %v1482_v51 }
 0x41b   :  { %1825 = vtanh.f32 %v1479_v35 }
 0x41c   :  { %1827 = vtanh.f32 %v1476_v57 }
 0x41d   :  { %1829 = vtanh.f32 %v1473_v62 }
 0x41e   :  { %v1820_v59 = vpop.eup %1819  ;;  %1831 = vtanh.f32 %v1470_v17 }
 0x41f   :  { %v1556_v2 = vmul.f32 %v1820_v59, %v1820_v59  ;;  %v1822_v43 = vpop.eup %1821  ;;  %1833 = vtanh.f32 %v1467_v0 }
 0x420   :  { %v1824_v33 = vpop.eup %1823  ;;  %v1554_v30 = vmul.f32 %v1822_v43, %v1822_v43  ;;  %1835 = vtanh.f32 %v1464_v23 }
 0x421   :  { %1577 = vmatpush.msra.mxu2 %v1556_v2  ;;  %v1826_v22 = vpop.eup %1825  ;;  %v1553_v16 = vmul.f32 %v1824_v33, %v1824_v33  ;;  %1837 = vtanh.f32 %v3118_v25 }
 0x422   :  { %v1828_v55 = vpop.eup %1827  ;;  %v1552_v28 = vmul.f32 %v1826_v22, %v1826_v22  ;;  %1839 = vtanh.f32 %v3115_v52 }
 0x423   :  { %1578 = vmatpush.msra.mxu2 %v1555_v20  ;;  %v1830_v40 = vpop.eup %1829  ;;  %v1551_v61 = vmul.f32 %v1828_v55, %v1828_v55  ;;  %1841 = vtanh.f32 %v3111_v15 }
 0x424   :  { %v1832_v14 = vpop.eup %1831  ;;  %v1550_v31 = vmul.f32 %v1830_v40, %v1830_v40  ;;  %1843 = vtanh.f32 %v3106_v34 }
 0x425   :  { %1579 = vmatpush.msra.mxu2 %v1554_v30  ;;  %v1834_v36 = vpop.eup %1833  ;;  %v1549_v1 = vmul.f32 %v1832_v14, %v1832_v14  ;;  %1845 = vtanh.f32 %v3094_v41 }
 0x426   :  { %v1836_v39 = vpop.eup %1835  ;;  %v1548_v50 = vmul.f32 %v1834_v36, %v1834_v36  ;;  %1847 = vtanh.f32 %v3082_v18 }
 0x427   :  { %1580 = vmatpush.msra.mxu2 %v1553_v16  ;;  %v1838_v53 = vpop.eup %1837  ;;  %v1547_v23 = vmul.f32 %v1836_v39, %v1836_v39 }
 0x428   :  { %v1840_v0 = vpop.eup %1839  ;;  %v1546_v25 = vmul.f32 %v1838_v53, %v1838_v53 }
 0x429   :  { %1581 = vmatpush.msra.mxu2 %v1552_v28  ;;  %v1842_v60 = vpop.eup %1841  ;;  %v1545_v52 = vmul.f32 %v1840_v0, %v1840_v0 }
 0x42a   :  { %v1844_v56 = vpop.eup %1843  ;;  %v1544_v17 = vmul.f32 %v1842_v60, %v1842_v60 }
 0x42b   :  { %1582 = vmatpush.msra.mxu2 %v1551_v61  ;;  %v1846_v15 = vpop.eup %1845  ;;  %v1543_v42 = vmul.f32 %v1844_v56, %v1844_v56 }
 0x42c   :  { %v1848_v38 = vpop.eup %1847  ;;  %v1542_v34 = vmul.f32 %v1846_v15, %v1846_v15 }
 0x42d   :  { %1583 = vmatpush.msra.mxu2 %v1550_v31  ;;  %v1541_v46 = vmul.f32 %v1848_v38, %v1848_v38 }
 0x42f   :  { %1584 = vmatpush.msra.mxu2 %v1549_v1 }
 0x431   :  { %1585 = vmatpush.msra.mxu2 %v1548_v50 }
 0x433   :  { %1586 = vmatpush.msra.mxu2 %v1547_v23 }
 0x435   :  { %1587 = vmatpush.msra.mxu2 %v1546_v25 }
 0x437   :  { %1588 = vmatpush.msra.mxu2 %v1545_v52 }
 0x439   :  { %1589 = vmatpush.msra.mxu2 %v1544_v17 }
 0x43b   :  { %1590 = vmatpush.msra.mxu2 %v1543_v42 }
 0x43d   :  { %1591 = vmatpush.msra.mxu2 %v1542_v34  ;;  %v1574_v41 = vpop.f32.mrf.mxu1 }
 0x43f   :  { %1592 = vmatpush.msra.mxu2 %v1541_v46 }
 0x440   :  { %1593 = vmatmul.f32.vlgmr.msra.gmra.mxu2 %v1876_v29 }
 0x4c3   :  { %v1594_v18 = vpop.f32.mrf.mxu2 }
 0x4c4   :  { %v1595_v3 = vadd.f32 %v1594_v18, %v1574_v41 }
 0x4c6   :  { %1598 = vst.msk [vmem:[#allocation2] sm:$0x1] %vm1597_vm1, %v1595_v3 }
 0x4c7   :  { %1609 = dma.vmem_to_hbm [thread:$0]  %s1605_s28, 16, %s1607_s8, [#allocation3]  }
 0x4c8   :  { %1873 = dma.done.wait [#allocation3], 16  }
 0x4c9   :  { %1874 = vsyncadd [#allocation3], 4294967280 }
 0x4ca   :  { %1614 = vsyncpa [#allocation3], 1 }

</bundles_post_ra>
